<compile_context>
chip_gen: v5e
topology: v5e:2x2
jax: 0.10.0
libtpu: 0.0.40
codegen_flags: <defaults>
</compile_context>

<pallas_src>
import math
from functools import partial

import jax
import jax.numpy as jnp
from jax.experimental import pallas as pl
from jax.experimental.pallas import tpu as pltpu


# ----------------------------------------------------------------------------
# Config (mirrors the fields the PyTorch module reads off `config`)
# ----------------------------------------------------------------------------
class Config:
    num_kernels = 8      # multiple of 4 -> G = num_kernels // 4 branches
    frequency = 16
    node_size = 16       # N
    D = 2
    p1 = 4               # temporal average-pool width
    dropout = 0.0        # p = 0 -> dropout is an exact identity


# ----------------------------------------------------------------------------
# In-kernel math helpers (ops guaranteed to lower in Mosaic; all f32)
# ----------------------------------------------------------------------------
def _erf(x):
    # Abramowitz & Stegun 7.1.26 (|abs err| < 1.5e-7).  The 1/(1+p|x|) divide
    # goes to the EUP via approximate reciprocal (frees VALU slots).
    a1, a2, a3, a4, a5 = (0.254829592, -0.284496736, 1.421413741,
                          -1.453152027, 1.061405429)
    p = 0.3275911
    ax = jnp.abs(x)
    t = pl.reciprocal(1.0 + p * ax, approx=True)
    poly = ((((a5 * t + a4) * t + a3) * t + a2) * t + a1) * t
    y = 1.0 - poly * jnp.exp(-ax * ax)
    return jnp.where(x >= 0, y, -y)


def _gelu(x):
    return 0.5 * x * (1.0 + _erf(x * (1.0 / math.sqrt(2.0))))


def _sigmoid(x):
    return pl.reciprocal(1.0 + jnp.exp(-x), approx=True)


# ----------------------------------------------------------------------------
# Single fused kernel
#   feature layout: rows = (b*N + n), cols = (c*T + t)   (t on lanes)
# ----------------------------------------------------------------------------
def _mva_fused_kernel(x_ref, m1_ref, b1_ref, m2_ref, b2_ref, w1t_ref, w2t_ref,
                      ksum_ref, ec_ref, wbd_ref, pool_ref,
                      out_ref, m2_vmem, m2_sem,
                      *, B, N, T, C, G, CD, bn1_eps, bn2_eps):
    f32 = jnp.float32
    bf16 = jnp.bfloat16

    # -- Prefetch the largest constant (m2, 128 KB bf16) behind stage-1 work.
    m2_copy = pltpu.make_async_copy(m2_ref, m2_vmem, m2_sem)
    m2_copy.start()

    # ---- Stage 1a: first temporal conv (banded matmul, bf16 MXU) + GELU -----
    h1 = _gelu(jnp.dot(x_ref[...], m1_ref[...], preferred_element_type=f32)
               + b1_ref[...])                                  # (B*N, 2G*T) f32
    h1b = h1.astype(bf16)

    # ---- Stage 1b: second temporal conv per branch (K = 2T, lane-concat) ----
    m2_copy.wait()
    feat = jnp.concatenate(
        [jnp.dot(h1b[:, g * 2 * T:(g + 1) * 2 * T], m2_vmem[g],
                 preferred_element_type=f32) for g in range(G)],
        axis=1) + b2_ref[...]                     # (B*N, C*T) f32, c = g*4 + c2

    # ---- Stage 2: SEAttention + BatchNorm2d(C), algebraically fused ---------
    # Per-(row, channel) sums over t of feat and feat^2 in ONE MXU issue.
    ff = jnp.dot(jnp.concatenate([feat, feat * feat], axis=0), ksum_ref[...],
                 preferred_element_type=f32)                   # (2*B*N, C)
    rs, rs2 = ff[:B * N, :], ff[B * N:, :]
    S1 = jnp.concatenate([jnp.sum(rs[b * N:(b + 1) * N], axis=0, keepdims=True)
                          for b in range(B)], axis=0)          # (B, C) sum (n,t)
    S2 = jnp.concatenate([jnp.sum(rs2[b * N:(b + 1) * N], axis=0, keepdims=True)
                          for b in range(B)], axis=0)          # (B, C)

    # SE: global average pool -> fc1 -> ReLU -> fc2 -> sigmoid
    pooled = S1 * (1.0 / float(N * T))                         # (B, C)
    hfc = jnp.maximum(
        jnp.dot(pooled, w1t_ref[...], preferred_element_type=f32), 0.0)
    z = _sigmoid(jnp.dot(hfc, w2t_ref[...], preferred_element_type=f32))  # (B,C)

    # BatchNorm2d(C) batch statistics of (feat * z) WITHOUT materializing it:
    #   sum  = sum_b z[b,c]   * S1[b,c]      sumsq = sum_b z[b,c]^2 * S2[b,c]
    inv_cnt1 = 1.0 / float(B * N * T)
    mean1 = jnp.sum(z * S1, axis=0, keepdims=True) * inv_cnt1          # (1, C)
    ex2 = jnp.sum(z * z * S2, axis=0, keepdims=True) * inv_cnt1
    var1 = jnp.maximum(ex2 - mean1 * mean1, 0.0)               # guard cancellation
    inv1 = jax.lax.rsqrt(var1 + bn1_eps)                               # (1, C)

    # normed = feat * (z*inv1)[b,c] - (mean1*inv1)[c] : ONE expand dot.
    a_bc = z * inv1                                                    # (B, C)
    arow = jnp.concatenate(
        [jnp.broadcast_to(a_bc[b:b + 1, :], (N, C)) for b in range(B)]
        + [-(mean1 * inv1)], axis=0)                                   # (B*N+1, C)
    aexp = jnp.dot(arow, ec_ref[...], preferred_element_type=f32)      # (B*N+1, C*T)
    normed = feat * aexp[:B * N, :] + aexp[B * N:B * N + 1, :]         # (B*N, C*T)

    # ---- Stage 3: dw_conv as ONE block-diagonal matmul (K = C*B*N) ----------
    # Stack activation rows as (c, b, n): C lane slices, concat over sublanes.
    act = jnp.concatenate([normed[:, c * T:(c + 1) * T] for c in range(C)],
                          axis=0).astype(bf16)                         # (C*B*N, T)
    pre = jnp.dot(wbd_ref[...], act, preferred_element_type=f32)       # (B*CD, T)

    # BatchNorm2d(C*D, eps=0) batch statistics per cd over (b, t).
    s1b = jnp.zeros((CD, 1), f32)
    s2b = jnp.zeros((CD, 1), f32)
    for b in range(B):
        blk = pre[b * CD:(b + 1) * CD, :]
        s1b = s1b + jnp.sum(blk, axis=1, keepdims=True)
        s2b = s2b + jnp.sum(blk * blk, axis=1, keepdims=True)
    inv_cnt2 = 1.0 / float(B * T)
    mean2 = s1b * inv_cnt2
    var2 = jnp.maximum(s2b * inv_cnt2 - mean2 * mean2, 0.0)
    # Reference uses nn.BatchNorm2d(C*D, False) -> eps == 0.0 (kept faithful;
    # an exactly-zero-variance channel would be a NaN hazard in the reference too).
    inv2 = jax.lax.rsqrt(var2 + bn2_eps)                               # (CD, 1)
    mean2f = jnp.concatenate([mean2] * B, axis=0)                      # (B*CD, 1)
    inv2f = jnp.concatenate([inv2] * B, axis=0)

    gb = _gelu((pre - mean2f) * inv2f)                                 # (B*CD, T)
    # AvgPool2d((1, p1)) as one matmul; single lane-contiguous output store.
    out_ref[...] = jnp.dot(gb, pool_ref[...], preferred_element_type=f32)


# ----------------------------------------------------------------------------
# Parameter construction (deterministic, synthetic)
# ----------------------------------------------------------------------------
def make_pairs(cfg):
    k = cfg.num_kernels // 4
    step = (cfg.frequency // 2) // k
    klist = list(range(1, cfg.frequency // 2, step))[:k]
    return list(zip(klist, list(reversed(klist))))


def init_params(key, cfg):
    C = cfg.num_kernels
    G = C // 4
    N = cfg.node_size
    pairs = make_pairs(cfg)
    # TODO(synk): even kernel sizes (the ZeroPad2d((0,(k1+k2)%2,0,0)) path) are
    # not implemented; the default kernel_list here yields odd sizes only.
    assert all(k1 % 2 == 1 and k2 % 2 == 1 for k1, k2 in pairs)
    Kmax = max(max(p) for p in pairs)
    keys = jax.random.split(key, 7)
    return dict(
        pairs=pairs, Kmax=Kmax,
        # conv1: (G, 2, Kmax) taps, (G, 2) bias
        w1=0.2 * jax.random.normal(keys[0], (G, 2, Kmax), jnp.float32),
        b1=0.1 * jax.random.normal(keys[1], (G, 2), jnp.float32),
        # conv2: (G, 4, 2, Kmax) taps, (G, 4) bias
        w2=0.2 * jax.random.normal(keys[2], (G, 4, 2, Kmax), jnp.float32),
        b2=0.1 * jax.random.normal(keys[3], (G, 4), jnp.float32),
        # SEAttention fc (bias=False, reduction=1): weight shape (out, in)=(C, C)
        w_fc1=0.3 * jax.random.normal(keys[4], (C, C), jnp.float32),
        w_fc2=0.3 * jax.random.normal(keys[5], (C, C), jnp.float32),
        # dw_conv: Conv2d(C, C*D, (node_size, 1), bias=False) -> (CD, C, N)
        w_dw=0.2 * jax.random.normal(keys[6], (C * cfg.D, C, N), jnp.float32),
    )


def _conv_band(taps, k, T):
    """(T,T) Toeplitz M s.t. (x @ M)[:, t] = sum_d taps[d]*x[:, t-(k-1)//2+d]
    with implicit zero padding ('same' conv, PyTorch cross-correlation)."""
    pad = (k - 1) // 2
    m = jnp.zeros((T, T), jnp.float32)
    for d in range(k):
        m = m + taps[d] * jnp.eye(T, T, k=pad - d, dtype=jnp.float32)
    return m


# ----------------------------------------------------------------------------
# Forward wrapper
# ----------------------------------------------------------------------------
def multi_view_attention(x, params, cfg):
    # x: (B, 1, N, T) float32 (NCHW, matching PyTorch)
    B, _, N, T = x.shape
    C = cfg.num_kernels
    G = C // 4
    CD = C * cfg.D
    pairs = params["pairs"]
    assert T % cfg.p1 == 0
    Tout = T // cfg.p1

    # ---- wrapper-side constants (tiny, one-off) -----------------------------
    m1_cols, m2_blocks = [], []
    for g, (k1, k2) in enumerate(pairs):
        for c1 in range(2):
            m1_cols.append(_conv_band(params["w1"][g, c1], k1, T))
        cols = []
        for c2 in range(4):
            rows = [_conv_band(params["w2"][g, c2, c1], k2, T) for c1 in range(2)]
            cols.append(jnp.concatenate(rows, axis=0))        # (2T, T)
        m2_blocks.append(jnp.concatenate(cols, axis=1))       # (2T, 4T)
    # bf16 constants: halves DMA bytes, native MXU rate (accumulate in f32).
    m1_all = jnp.concatenate(m1_cols, axis=1).astype(jnp.bfloat16)   # (T, 2G*T)
    m2_all = jnp.stack(m2_blocks, axis=0).astype(jnp.bfloat16)       # (G, 2T, 4T)
    b1_row = jnp.repeat(params["b1"].reshape(-1), T)[None, :]         # (1, 2G*T) f32
    b2_row = jnp.repeat(params["b2"].reshape(-1), T)[None, :]         # (1, C*T)  f32

    # One-hot helpers kept in f32 so BN statistics stay exact.
    ksum = (jnp.arange(C * T)[:, None] // T
            == jnp.arange(C)[None, :]).astype(jnp.float32)     # (C*T, C) sum-over-t
    ec = ksum.T                                                # (C, C*T) expand-over-t
    pool = ((jnp.arange(T)[:, None] // cfg.p1
             == jnp.arange(Tout)[None, :]).astype(jnp.float32)
            / float(cfg.p1))                                   # (T, Tout)

    # dw_conv weight as ONE lane-dense block-diagonal matrix:
    #   wbd[b*CD + cd, c*B*N + b*N + n] = w_dw[cd, c, n]
    wbd = jnp.einsum('ab,dcn->adcbn', jnp.eye(B, dtype=jnp.float32),
                     params["w_dw"]).reshape(B * CD, C * B * N).astype(jnp.bfloat16)

    xin = x[:, 0, :, :].reshape(B * N, T).astype(jnp.bfloat16)

    out = pl.pallas_call(
        partial(_mva_fused_kernel, B=B, N=N, T=T, C=C, G=G, CD=CD,
                bn1_eps=1e-5, bn2_eps=0.0),
        out_shape=jax.ShapeDtypeStruct((B * CD, Tout), jnp.float32),
        grid=(1,),
        in_specs=[
            pl.BlockSpec((B * N, T), lambda i: (0, 0)),            # xin (bf16)
            pl.BlockSpec((T, 2 * G * T), lambda i: (0, 0)),        # m1_all (bf16)
            pl.BlockSpec((1, 2 * G * T), lambda i: (0, 0)),        # b1_row
            pl.BlockSpec(memory_space=pl.ANY),                     # m2_all (manual DMA)
            pl.BlockSpec((1, C * T), lambda i: (0, 0)),            # b2_row
            pl.BlockSpec((C, C), lambda i: (0, 0)),                # w_fc1^T
            pl.BlockSpec((C, C), lambda i: (0, 0)),                # w_fc2^T
            pl.BlockSpec((C * T, C), lambda i: (0, 0)),            # ksum
            pl.BlockSpec((C, C * T), lambda i: (0, 0)),            # ec
            pl.BlockSpec((B * CD, C * B * N), lambda i: (0, 0)),   # wbd (bf16)
            pl.BlockSpec((T, Tout), lambda i: (0, 0)),             # pool
        ],
        out_specs=pl.BlockSpec((B * CD, Tout), lambda i: (0, 0)),
        scratch_shapes=[pltpu.VMEM((G, 2 * T, 4 * T), jnp.bfloat16),
                        pltpu.SemaphoreType.DMA],
        compiler_params=pltpu.CompilerParams(
            dimension_semantics=("arbitrary",)),
    )(xin, m1_all, b1_row, m2_all, b2_row,
      params["w_fc1"].T, params["w_fc2"].T, ksum, ec, wbd, pool)

    # Dropout(p=cfg.dropout): p = 0.0 -> exact identity.
    # TODO(synk): non-zero dropout (random mask) intentionally not implemented.
    return out.reshape(B, CD, Tout)[:, :, None, :]             # (B, C*D, 1, Tout)


if __name__ == "__main__":
    cfg = Config()
    key = jax.random.PRNGKey(0)
    k_x, k_p = jax.random.split(key)
    B, N, T = 2, cfg.node_size, 64
    x = jax.random.normal(k_x, (B, 1, N, T), jnp.float32)
    params = init_params(k_p, cfg)

    out = multi_view_attention(x, params, cfg)
    out = jax.block_until_ready(out)

    expected = (B, cfg.num_kernels * cfg.D, 1, T // cfg.p1)
    assert out.shape == expected, (out.shape, expected)
    assert bool(jnp.all(jnp.isfinite(out)))
    print("KERNEL_OK")
</pallas_src>

<mosaic_0001>
module attributes {stable_mosaic.version = 11 : i64} {
  func.func @_mva_fused_kernel(%arg0: i32, %arg1: memref<32x64xbf16, #tpu.memory_space<vmem>>, %arg2: memref<64x256xbf16, #tpu.memory_space<vmem>>, %arg3: memref<1x256xf32, #tpu.memory_space<vmem>>, %arg4: memref<2x128x256xbf16, #tpu.memory_space<any>>, %arg5: memref<1x512xf32, #tpu.memory_space<vmem>>, %arg6: memref<8x8xf32, #tpu.memory_space<vmem>>, %arg7: memref<8x8xf32, #tpu.memory_space<vmem>>, %arg8: memref<512x8xf32, #tpu.memory_space<vmem>>, %arg9: memref<8x512xf32, #tpu.memory_space<vmem>>, %arg10: memref<32x256xbf16, #tpu.memory_space<vmem>>, %arg11: memref<64x16xf32, #tpu.memory_space<vmem>>, %arg12: memref<32x16xf32, #tpu.memory_space<vmem>>, %arg13: memref<2x128x256xbf16, #tpu.memory_space<vmem>>, %arg14: memref<!tpu.dma_semaphore, #tpu.memory_space<semaphore_mem>>) attributes {dimension_semantics = [#tpu.dimension_semantics<arbitrary>], iteration_bounds = array<i64: 1>, scalar_prefetch = 0 : i64, scratch_operands = 2 : i64, tpu.core_type = #tpu.core_type<tc>, window_params = [{pipeline_mode = #tpu.pipeline_mode<synchronous>, transform_indices = @transform_0, window_bounds = array<i64: 32, 64>}, {pipeline_mode = #tpu.pipeline_mode<synchronous>, transform_indices = @transform_1, window_bounds = array<i64: 64, 256>}, {pipeline_mode = #tpu.pipeline_mode<synchronous>, transform_indices = @transform_2, window_bounds = array<i64: 1, 256>}, {}, {pipeline_mode = #tpu.pipeline_mode<synchronous>, transform_indices = @transform_4, window_bounds = array<i64: 1, 512>}, {pipeline_mode = #tpu.pipeline_mode<synchronous>, transform_indices = @transform_5, window_bounds = array<i64: 8, 8>}, {pipeline_mode = #tpu.pipeline_mode<synchronous>, transform_indices = @transform_6, window_bounds = array<i64: 8, 8>}, {pipeline_mode = #tpu.pipeline_mode<synchronous>, transform_indices = @transform_7, window_bounds = array<i64: 512, 8>}, {pipeline_mode = #tpu.pipeline_mode<synchronous>, transform_indices = @transform_8, window_bounds = array<i64: 8, 512>}, {pipeline_mode = #tpu.pipeline_mode<synchronous>, transform_indices = @transform_9, window_bounds = array<i64: 32, 256>}, {pipeline_mode = #tpu.pipeline_mode<synchronous>, transform_indices = @transform_10, window_bounds = array<i64: 64, 16>}, {pipeline_mode = #tpu.pipeline_mode<synchronous>, transform_indices = @transform_11, window_bounds = array<i64: 32, 16>}]} {
    tpu.enqueue_dma source(%arg4 : memref<2x128x256xbf16, #tpu.memory_space<any>>) target(%arg13 : memref<2x128x256xbf16, #tpu.memory_space<vmem>>) target_semaphore(%arg14 : memref<!tpu.dma_semaphore, #tpu.memory_space<semaphore_mem>>)
    %c0 = arith.constant 0 : index
    %c0_0 = arith.constant 0 : index
    %0 = vector.load %arg1[%c0, %c0_0] : memref<32x64xbf16, #tpu.memory_space<vmem>>, vector<32x64xbf16>
    %c0_1 = arith.constant 0 : index
    %c0_2 = arith.constant 0 : index
    %1 = vector.load %arg2[%c0_1, %c0_2] : memref<64x256xbf16, #tpu.memory_space<vmem>>, vector<64x256xbf16>
    %cst = arith.constant dense<0.000000e+00> : vector<32x256xf32>
    %2 = tpu.matmul %0, %1, %cst {dimension_numbers = #tpu.dot_dimension_numbers<[1], [0], [0], [1], [0, 0, 1, 1], [], []>} : vector<32x64xbf16>, vector<64x256xbf16>, vector<32x256xf32> -> vector<32x256xf32>
    %c0_3 = arith.constant 0 : index
    %c0_4 = arith.constant 0 : index
    %3 = vector.load %arg3[%c0_3, %c0_4] : memref<1x256xf32, #tpu.memory_space<vmem>>, vector<1x256xf32>
    %4 = vector.broadcast %3 : vector<1x256xf32> to vector<32x256xf32>
    %5 = arith.addf %2, %4 : vector<32x256xf32>
    %cst_5 = arith.constant 5.000000e-01 : f32
    %6 = vector.broadcast %cst_5 : f32 to vector<32x256xf32>
    %7 = arith.mulf %6, %5 : vector<32x256xf32>
    %cst_6 = arith.constant 0.707106769 : f32
    %8 = vector.broadcast %cst_6 : f32 to vector<32x256xf32>
    %9 = arith.mulf %5, %8 : vector<32x256xf32>
    %10 = math.absf %9 : vector<32x256xf32>
    %cst_7 = arith.constant 0.327591091 : f32
    %11 = vector.broadcast %cst_7 : f32 to vector<32x256xf32>
    %12 = arith.mulf %11, %10 : vector<32x256xf32>
    %cst_8 = arith.constant 1.000000e+00 : f32
    %13 = vector.broadcast %cst_8 : f32 to vector<32x256xf32>
    %14 = arith.addf %13, %12 : vector<32x256xf32>
    %15 = tpu.reciprocal %14 {approx = true} : vector<32x256xf32> -> vector<32x256xf32>
    %cst_9 = arith.constant 1.06140542 : f32
    %16 = vector.broadcast %cst_9 : f32 to vector<32x256xf32>
    %17 = arith.mulf %16, %15 : vector<32x256xf32>
    %cst_10 = arith.constant -1.45315206 : f32
    %18 = vector.broadcast %cst_10 : f32 to vector<32x256xf32>
    %19 = arith.addf %17, %18 : vector<32x256xf32>
    %20 = arith.mulf %19, %15 : vector<32x256xf32>
    %cst_11 = arith.constant 1.42141378 : f32
    %21 = vector.broadcast %cst_11 : f32 to vector<32x256xf32>
    %22 = arith.addf %20, %21 : vector<32x256xf32>
    %23 = arith.mulf %22, %15 : vector<32x256xf32>
    %cst_12 = arith.constant -0.284496725 : f32
    %24 = vector.broadcast %cst_12 : f32 to vector<32x256xf32>
    %25 = arith.addf %23, %24 : vector<32x256xf32>
    %26 = arith.mulf %25, %15 : vector<32x256xf32>
    %cst_13 = arith.constant 0.254829586 : f32
    %27 = vector.broadcast %cst_13 : f32 to vector<32x256xf32>
    %28 = arith.addf %26, %27 : vector<32x256xf32>
    %29 = arith.mulf %28, %15 : vector<32x256xf32>
    %cst_14 = arith.constant 0.000000e+00 : f32
    %30 = vector.broadcast %cst_14 : f32 to vector<32x256xf32>
    %31 = arith.subf %30, %10 : vector<32x256xf32>
    %32 = arith.mulf %31, %10 : vector<32x256xf32>
    %33 = math.exp %32 : vector<32x256xf32>
    %34 = arith.mulf %29, %33 : vector<32x256xf32>
    %cst_15 = arith.constant 1.000000e+00 : f32
    %35 = vector.broadcast %cst_15 : f32 to vector<32x256xf32>
    %36 = arith.subf %35, %34 : vector<32x256xf32>
    %cst_16 = arith.constant 0.000000e+00 : f32
    %37 = vector.broadcast %cst_16 : f32 to vector<32x256xf32>
    %38 = arith.cmpf oge, %9, %37 : vector<32x256xf32>
    %cst_17 = arith.constant 0.000000e+00 : f32
    %39 = vector.broadcast %cst_17 : f32 to vector<32x256xf32>
    %40 = arith.subf %39, %36 : vector<32x256xf32>
    %41 = arith.select %38, %36, %40 : vector<32x256xi1>, vector<32x256xf32>
    %cst_18 = arith.constant 1.000000e+00 : f32
    %42 = vector.broadcast %cst_18 : f32 to vector<32x256xf32>
    %43 = arith.addf %42, %41 : vector<32x256xf32>
    %44 = arith.mulf %7, %43 : vector<32x256xf32>
    %45 = arith.truncf %44 : vector<32x256xf32> to vector<32x256xbf16>
    tpu.wait_dma2 semaphore(%arg14 : memref<!tpu.dma_semaphore, #tpu.memory_space<semaphore_mem>>) src(%arg4 : memref<2x128x256xbf16, #tpu.memory_space<any>>) dst(%arg13 : memref<2x128x256xbf16, #tpu.memory_space<vmem>>)
    %46 = vector.extract_strided_slice %45 {offsets = [0, 0], sizes = [32, 128], strides = [1, 1]} : vector<32x256xbf16> to vector<32x128xbf16>
    %c0_19 = arith.constant 0 : index
    %c0_20 = arith.constant 0 : index
    %c0_21 = arith.constant 0 : index
    %47 = vector.load %arg13[%c0_19, %c0_20, %c0_21] : memref<2x128x256xbf16, #tpu.memory_space<vmem>>, vector<1x128x256xbf16>
    %48 = vector.shape_cast %47 : vector<1x128x256xbf16> to vector<128x256xbf16>
    %cst_22 = arith.constant dense<0.000000e+00> : vector<32x256xf32>
    %49 = tpu.matmul %46, %48, %cst_22 {dimension_numbers = #tpu.dot_dimension_numbers<[1], [0], [0], [1], [0, 0, 1, 1], [], []>} : vector<32x128xbf16>, vector<128x256xbf16>, vector<32x256xf32> -> vector<32x256xf32>
    %50 = vector.extract_strided_slice %45 {offsets = [0, 128], sizes = [32, 128], strides = [1, 1]} : vector<32x256xbf16> to vector<32x128xbf16>
    %c1 = arith.constant 1 : index
    %c0_23 = arith.constant 0 : index
    %c0_24 = arith.constant 0 : index
    %51 = vector.load %arg13[%c1, %c0_23, %c0_24] : memref<2x128x256xbf16, #tpu.memory_space<vmem>>, vector<1x128x256xbf16>
    %52 = vector.shape_cast %51 : vector<1x128x256xbf16> to vector<128x256xbf16>
    %cst_25 = arith.constant dense<0.000000e+00> : vector<32x256xf32>
    %53 = tpu.matmul %50, %52, %cst_25 {dimension_numbers = #tpu.dot_dimension_numbers<[1], [0], [0], [1], [0, 0, 1, 1], [], []>} : vector<32x128xbf16>, vector<128x256xbf16>, vector<32x256xf32> -> vector<32x256xf32>
    %54 = tpu.concatenate %49, %53 in 1 : vector<32x256xf32>, vector<32x256xf32> -> vector<32x512xf32>
    %c0_26 = arith.constant 0 : index
    %c0_27 = arith.constant 0 : index
    %55 = vector.load %arg5[%c0_26, %c0_27] : memref<1x512xf32, #tpu.memory_space<vmem>>, vector<1x512xf32>
    %56 = vector.broadcast %55 : vector<1x512xf32> to vector<32x512xf32>
    %57 = arith.addf %54, %56 : vector<32x512xf32>
    %58 = arith.mulf %57, %57 : vector<32x512xf32>
    %59 = tpu.concatenate %57, %58 in 0 : vector<32x512xf32>, vector<32x512xf32> -> vector<64x512xf32>
    %c0_28 = arith.constant 0 : index
    %c0_29 = arith.constant 0 : index
    %60 = vector.load %arg8[%c0_28, %c0_29] : memref<512x8xf32, #tpu.memory_space<vmem>>, vector<512x8xf32>
    %cst_30 = arith.constant dense<0.000000e+00> : vector<64x8xf32>
    %61 = tpu.matmul %59, %60, %cst_30 {dimension_numbers = #tpu.dot_dimension_numbers<[1], [0], [0], [1], [0, 0, 1, 1], [], []>} : vector<64x512xf32>, vector<512x8xf32>, vector<64x8xf32> -> vector<64x8xf32>
    %62 = vector.extract_strided_slice %61 {offsets = [0, 0], sizes = [32, 8], strides = [1, 1]} : vector<64x8xf32> to vector<32x8xf32>
    %63 = vector.extract_strided_slice %61 {offsets = [32, 0], sizes = [32, 8], strides = [1, 1]} : vector<64x8xf32> to vector<32x8xf32>
    %64 = vector.extract_strided_slice %62 {offsets = [0, 0], sizes = [16, 8], strides = [1, 1]} : vector<32x8xf32> to vector<16x8xf32>
    %cst_31 = arith.constant dense<0.000000e+00> : vector<8xf32>
    %65 = vector.multi_reduction <add>, %64, %cst_31 [0] : vector<16x8xf32> to vector<8xf32>
    %66 = vector.shape_cast %65 : vector<8xf32> to vector<1x8xf32>
    %67 = vector.extract_strided_slice %62 {offsets = [16, 0], sizes = [16, 8], strides = [1, 1]} : vector<32x8xf32> to vector<16x8xf32>
    %cst_32 = arith.constant dense<0.000000e+00> : vector<8xf32>
    %68 = vector.multi_reduction <add>, %67, %cst_32 [0] : vector<16x8xf32> to vector<8xf32>
    %69 = vector.shape_cast %68 : vector<8xf32> to vector<1x8xf32>
    %70 = tpu.concatenate %66, %69 in 0 : vector<1x8xf32>, vector<1x8xf32> -> vector<2x8xf32>
    %71 = vector.extract_strided_slice %63 {offsets = [0, 0], sizes = [16, 8], strides = [1, 1]} : vector<32x8xf32> to vector<16x8xf32>
    %cst_33 = arith.constant dense<0.000000e+00> : vector<8xf32>
    %72 = vector.multi_reduction <add>, %71, %cst_33 [0] : vector<16x8xf32> to vector<8xf32>
    %73 = vector.shape_cast %72 : vector<8xf32> to vector<1x8xf32>
    %74 = vector.extract_strided_slice %63 {offsets = [16, 0], sizes = [16, 8], strides = [1, 1]} : vector<32x8xf32> to vector<16x8xf32>
    %cst_34 = arith.constant dense<0.000000e+00> : vector<8xf32>
    %75 = vector.multi_reduction <add>, %74, %cst_34 [0] : vector<16x8xf32> to vector<8xf32>
    %76 = vector.shape_cast %75 : vector<8xf32> to vector<1x8xf32>
    %77 = tpu.concatenate %73, %76 in 0 : vector<1x8xf32>, vector<1x8xf32> -> vector<2x8xf32>
    %cst_35 = arith.constant 9.765625E-4 : f32
    %78 = vector.broadcast %cst_35 : f32 to vector<2x8xf32>
    %79 = arith.mulf %70, %78 : vector<2x8xf32>
    %c0_36 = arith.constant 0 : index
    %c0_37 = arith.constant 0 : index
    %80 = vector.load %arg6[%c0_36, %c0_37] : memref<8x8xf32, #tpu.memory_space<vmem>>, vector<8x8xf32>
    %cst_38 = arith.constant dense<0.000000e+00> : vector<2x8xf32>
    %81 = tpu.matmul %79, %80, %cst_38 {dimension_numbers = #tpu.dot_dimension_numbers<[1], [0], [0], [1], [0, 0, 1, 1], [], []>} : vector<2x8xf32>, vector<8x8xf32>, vector<2x8xf32> -> vector<2x8xf32>
    %cst_39 = arith.constant 0.000000e+00 : f32
    %82 = vector.broadcast %cst_39 : f32 to vector<2x8xf32>
    %83 = arith.maximumf %81, %82 : vector<2x8xf32>
    %c0_40 = arith.constant 0 : index
    %c0_41 = arith.constant 0 : index
    %84 = vector.load %arg7[%c0_40, %c0_41] : memref<8x8xf32, #tpu.memory_space<vmem>>, vector<8x8xf32>
    %cst_42 = arith.constant dense<0.000000e+00> : vector<2x8xf32>
    %85 = tpu.matmul %83, %84, %cst_42 {dimension_numbers = #tpu.dot_dimension_numbers<[1], [0], [0], [1], [0, 0, 1, 1], [], []>} : vector<2x8xf32>, vector<8x8xf32>, vector<2x8xf32> -> vector<2x8xf32>
    %cst_43 = arith.constant 0.000000e+00 : f32
    %86 = vector.broadcast %cst_43 : f32 to vector<2x8xf32>
    %87 = arith.subf %86, %85 : vector<2x8xf32>
    %88 = math.exp %87 : vector<2x8xf32>
    %cst_44 = arith.constant 1.000000e+00 : f32
    %89 = vector.broadcast %cst_44 : f32 to vector<2x8xf32>
    %90 = arith.addf %89, %88 : vector<2x8xf32>
    %91 = tpu.reciprocal %90 {approx = true} : vector<2x8xf32> -> vector<2x8xf32>
    %92 = arith.mulf %91, %70 : vector<2x8xf32>
    %cst_45 = arith.constant dense<0.000000e+00> : vector<8xf32>
    %93 = vector.multi_reduction <add>, %92, %cst_45 [0] : vector<2x8xf32> to vector<8xf32>
    %94 = vector.shape_cast %93 : vector<8xf32> to vector<1x8xf32>
    %cst_46 = arith.constant 4.8828125E-4 : f32
    %95 = vector.broadcast %cst_46 : f32 to vector<1x8xf32>
    %96 = arith.mulf %94, %95 : vector<1x8xf32>
    %97 = arith.mulf %91, %91 : vector<2x8xf32>
    %98 = arith.mulf %97, %77 : vector<2x8xf32>
    %cst_47 = arith.constant dense<0.000000e+00> : vector<8xf32>
    %99 = vector.multi_reduction <add>, %98, %cst_47 [0] : vector<2x8xf32> to vector<8xf32>
    %100 = vector.shape_cast %99 : vector<8xf32> to vector<1x8xf32>
    %cst_48 = arith.constant 4.8828125E-4 : f32
    %101 = vector.broadcast %cst_48 : f32 to vector<1x8xf32>
    %102 = arith.mulf %100, %101 : vector<1x8xf32>
    %103 = arith.mulf %96, %96 : vector<1x8xf32>
    %104 = arith.subf %102, %103 : vector<1x8xf32>
    %cst_49 = arith.constant 0.000000e+00 : f32
    %105 = vector.broadcast %cst_49 : f32 to vector<1x8xf32>
    %106 = arith.maximumf %104, %105 : vector<1x8xf32>
    %cst_50 = arith.constant 9.99999974E-6 : f32
    %107 = vector.broadcast %cst_50 : f32 to vector<1x8xf32>
    %108 = arith.addf %106, %107 : vector<1x8xf32>
    %109 = math.rsqrt %108 : vector<1x8xf32>
    %110 = vector.broadcast %109 : vector<1x8xf32> to vector<2x8xf32>
    %111 = arith.mulf %91, %110 : vector<2x8xf32>
    %112 = vector.extract_strided_slice %111 {offsets = [0, 0], sizes = [1, 8], strides = [1, 1]} : vector<2x8xf32> to vector<1x8xf32>
    %113 = vector.shape_cast %112 : vector<1x8xf32> to vector<1x8xf32>
    %114 = vector.broadcast %113 : vector<1x8xf32> to vector<16x8xf32>
    %115 = vector.extract_strided_slice %111 {offsets = [1, 0], sizes = [1, 8], strides = [1, 1]} : vector<2x8xf32> to vector<1x8xf32>
    %116 = vector.shape_cast %115 : vector<1x8xf32> to vector<1x8xf32>
    %117 = vector.broadcast %116 : vector<1x8xf32> to vector<16x8xf32>
    %118 = arith.mulf %96, %109 : vector<1x8xf32>
    %cst_51 = arith.constant 0.000000e+00 : f32
    %119 = vector.broadcast %cst_51 : f32 to vector<1x8xf32>
    %120 = arith.subf %119, %118 : vector<1x8xf32>
    %121 = tpu.concatenate %114, %117, %120 in 0 : vector<16x8xf32>, vector<16x8xf32>, vector<1x8xf32> -> vector<33x8xf32>
    %c0_52 = arith.constant 0 : index
    %c0_53 = arith.constant 0 : index
    %122 = vector.load %arg9[%c0_52, %c0_53] : memref<8x512xf32, #tpu.memory_space<vmem>>, vector<8x512xf32>
    %cst_54 = arith.constant dense<0.000000e+00> : vector<33x512xf32>
    %123 = tpu.matmul %121, %122, %cst_54 {dimension_numbers = #tpu.dot_dimension_numbers<[1], [0], [0], [1], [0, 0, 1, 1], [], []>} : vector<33x8xf32>, vector<8x512xf32>, vector<33x512xf32> -> vector<33x512xf32>
    %124 = vector.extract_strided_slice %123 {offsets = [0, 0], sizes = [32, 512], strides = [1, 1]} : vector<33x512xf32> to vector<32x512xf32>
    %125 = arith.mulf %57, %124 : vector<32x512xf32>
    %126 = vector.extract_strided_slice %123 {offsets = [32, 0], sizes = [1, 512], strides = [1, 1]} : vector<33x512xf32> to vector<1x512xf32>
    %127 = vector.broadcast %126 : vector<1x512xf32> to vector<32x512xf32>
    %128 = arith.addf %125, %127 : vector<32x512xf32>
    %129 = vector.extract_strided_slice %128 {offsets = [0, 0], sizes = [32, 64], strides = [1, 1]} : vector<32x512xf32> to vector<32x64xf32>
    %130 = vector.extract_strided_slice %128 {offsets = [0, 64], sizes = [32, 64], strides = [1, 1]} : vector<32x512xf32> to vector<32x64xf32>
    %131 = vector.extract_strided_slice %128 {offsets = [0, 128], sizes = [32, 64], strides = [1, 1]} : vector<32x512xf32> to vector<32x64xf32>
    %132 = vector.extract_strided_slice %128 {offsets = [0, 192], sizes = [32, 64], strides = [1, 1]} : vector<32x512xf32> to vector<32x64xf32>
    %133 = vector.extract_strided_slice %128 {offsets = [0, 256], sizes = [32, 64], strides = [1, 1]} : vector<32x512xf32> to vector<32x64xf32>
    %134 = vector.extract_strided_slice %128 {offsets = [0, 320], sizes = [32, 64], strides = [1, 1]} : vector<32x512xf32> to vector<32x64xf32>
    %135 = vector.extract_strided_slice %128 {offsets = [0, 384], sizes = [32, 64], strides = [1, 1]} : vector<32x512xf32> to vector<32x64xf32>
    %136 = vector.extract_strided_slice %128 {offsets = [0, 448], sizes = [32, 64], strides = [1, 1]} : vector<32x512xf32> to vector<32x64xf32>
    %137 = tpu.concatenate %129, %130, %131, %132, %133, %134, %135, %136 in 0 : vector<32x64xf32>, vector<32x64xf32>, vector<32x64xf32>, vector<32x64xf32>, vector<32x64xf32>, vector<32x64xf32>, vector<32x64xf32>, vector<32x64xf32> -> vector<256x64xf32>
    %138 = arith.truncf %137 : vector<256x64xf32> to vector<256x64xbf16>
    %c0_55 = arith.constant 0 : index
    %c0_56 = arith.constant 0 : index
    %139 = vector.load %arg10[%c0_55, %c0_56] : memref<32x256xbf16, #tpu.memory_space<vmem>>, vector<32x256xbf16>
    %cst_57 = arith.constant dense<0.000000e+00> : vector<32x64xf32>
    %140 = tpu.matmul %139, %138, %cst_57 {dimension_numbers = #tpu.dot_dimension_numbers<[1], [0], [0], [1], [0, 0, 1, 1], [], []>} : vector<32x256xbf16>, vector<256x64xbf16>, vector<32x64xf32> -> vector<32x64xf32>
    %cst_58 = arith.constant 0.000000e+00 : f32
    %141 = vector.broadcast %cst_58 : f32 to vector<16x1xf32>
    %cst_59 = arith.constant 0.000000e+00 : f32
    %142 = vector.broadcast %cst_59 : f32 to vector<16x1xf32>
    %143 = vector.extract_strided_slice %140 {offsets = [0, 0], sizes = [16, 64], strides = [1, 1]} : vector<32x64xf32> to vector<16x64xf32>
    %cst_60 = arith.constant dense<0.000000e+00> : vector<16xf32>
    %144 = vector.multi_reduction <add>, %143, %cst_60 [1] : vector<16x64xf32> to vector<16xf32>
    %145 = vector.shape_cast %144 : vector<16xf32> to vector<16x1xf32>
    %146 = arith.addf %141, %145 : vector<16x1xf32>
    %147 = arith.mulf %143, %143 : vector<16x64xf32>
    %cst_61 = arith.constant dense<0.000000e+00> : vector<16xf32>
    %148 = vector.multi_reduction <add>, %147, %cst_61 [1] : vector<16x64xf32> to vector<16xf32>
    %149 = vector.shape_cast %148 : vector<16xf32> to vector<16x1xf32>
    %150 = arith.addf %142, %149 : vector<16x1xf32>
    %151 = vector.extract_strided_slice %140 {offsets = [16, 0], sizes = [16, 64], strides = [1, 1]} : vector<32x64xf32> to vector<16x64xf32>
    %cst_62 = arith.constant dense<0.000000e+00> : vector<16xf32>
    %152 = vector.multi_reduction <add>, %151, %cst_62 [1] : vector<16x64xf32> to vector<16xf32>
    %153 = vector.shape_cast %152 : vector<16xf32> to vector<16x1xf32>
    %154 = arith.addf %146, %153 : vector<16x1xf32>
    %155 = arith.mulf %151, %151 : vector<16x64xf32>
    %cst_63 = arith.constant dense<0.000000e+00> : vector<16xf32>
    %156 = vector.multi_reduction <add>, %155, %cst_63 [1] : vector<16x64xf32> to vector<16xf32>
    %157 = vector.shape_cast %156 : vector<16xf32> to vector<16x1xf32>
    %158 = arith.addf %150, %157 : vector<16x1xf32>
    %cst_64 = arith.constant 7.812500e-03 : f32
    %159 = vector.broadcast %cst_64 : f32 to vector<16x1xf32>
    %160 = arith.mulf %154, %159 : vector<16x1xf32>
    %cst_65 = arith.constant 7.812500e-03 : f32
    %161 = vector.broadcast %cst_65 : f32 to vector<16x1xf32>
    %162 = arith.mulf %158, %161 : vector<16x1xf32>
    %163 = arith.mulf %160, %160 : vector<16x1xf32>
    %164 = arith.subf %162, %163 : vector<16x1xf32>
    %cst_66 = arith.constant 0.000000e+00 : f32
    %165 = vector.broadcast %cst_66 : f32 to vector<16x1xf32>
    %166 = arith.maximumf %164, %165 : vector<16x1xf32>
    %cst_67 = arith.constant 0.000000e+00 : f32
    %167 = vector.broadcast %cst_67 : f32 to vector<16x1xf32>
    %168 = arith.addf %166, %167 : vector<16x1xf32>
    %169 = math.rsqrt %168 : vector<16x1xf32>
    %170 = tpu.concatenate %160, %160 in 0 : vector<16x1xf32>, vector<16x1xf32> -> vector<32x1xf32>
    %171 = tpu.concatenate %169, %169 in 0 : vector<16x1xf32>, vector<16x1xf32> -> vector<32x1xf32>
    %172 = vector.broadcast %170 : vector<32x1xf32> to vector<32x64xf32>
    %173 = arith.subf %140, %172 : vector<32x64xf32>
    %174 = vector.broadcast %171 : vector<32x1xf32> to vector<32x64xf32>
    %175 = arith.mulf %173, %174 : vector<32x64xf32>
    %cst_68 = arith.constant 5.000000e-01 : f32
    %176 = vector.broadcast %cst_68 : f32 to vector<32x64xf32>
    %177 = arith.mulf %176, %175 : vector<32x64xf32>
    %cst_69 = arith.constant 0.707106769 : f32
    %178 = vector.broadcast %cst_69 : f32 to vector<32x64xf32>
    %179 = arith.mulf %175, %178 : vector<32x64xf32>
    %180 = math.absf %179 : vector<32x64xf32>
    %cst_70 = arith.constant 0.327591091 : f32
    %181 = vector.broadcast %cst_70 : f32 to vector<32x64xf32>
    %182 = arith.mulf %181, %180 : vector<32x64xf32>
    %cst_71 = arith.constant 1.000000e+00 : f32
    %183 = vector.broadcast %cst_71 : f32 to vector<32x64xf32>
    %184 = arith.addf %183, %182 : vector<32x64xf32>
    %185 = tpu.reciprocal %184 {approx = true} : vector<32x64xf32> -> vector<32x64xf32>
    %cst_72 = arith.constant 1.06140542 : f32
    %186 = vector.broadcast %cst_72 : f32 to vector<32x64xf32>
    %187 = arith.mulf %186, %185 : vector<32x64xf32>
    %cst_73 = arith.constant -1.45315206 : f32
    %188 = vector.broadcast %cst_73 : f32 to vector<32x64xf32>
    %189 = arith.addf %187, %188 : vector<32x64xf32>
    %190 = arith.mulf %189, %185 : vector<32x64xf32>
    %cst_74 = arith.constant 1.42141378 : f32
    %191 = vector.broadcast %cst_74 : f32 to vector<32x64xf32>
    %192 = arith.addf %190, %191 : vector<32x64xf32>
    %193 = arith.mulf %192, %185 : vector<32x64xf32>
    %cst_75 = arith.constant -0.284496725 : f32
    %194 = vector.broadcast %cst_75 : f32 to vector<32x64xf32>
    %195 = arith.addf %193, %194 : vector<32x64xf32>
    %196 = arith.mulf %195, %185 : vector<32x64xf32>
    %cst_76 = arith.constant 0.254829586 : f32
    %197 = vector.broadcast %cst_76 : f32 to vector<32x64xf32>
    %198 = arith.addf %196, %197 : vector<32x64xf32>
    %199 = arith.mulf %198, %185 : vector<32x64xf32>
    %cst_77 = arith.constant 0.000000e+00 : f32
    %200 = vector.broadcast %cst_77 : f32 to vector<32x64xf32>
    %201 = arith.subf %200, %180 : vector<32x64xf32>
    %202 = arith.mulf %201, %180 : vector<32x64xf32>
    %203 = math.exp %202 : vector<32x64xf32>
    %204 = arith.mulf %199, %203 : vector<32x64xf32>
    %cst_78 = arith.constant 1.000000e+00 : f32
    %205 = vector.broadcast %cst_78 : f32 to vector<32x64xf32>
    %206 = arith.subf %205, %204 : vector<32x64xf32>
    %cst_79 = arith.constant 0.000000e+00 : f32
    %207 = vector.broadcast %cst_79 : f32 to vector<32x64xf32>
    %208 = arith.cmpf oge, %179, %207 : vector<32x64xf32>
    %cst_80 = arith.constant 0.000000e+00 : f32
    %209 = vector.broadcast %cst_80 : f32 to vector<32x64xf32>
    %210 = arith.subf %209, %206 : vector<32x64xf32>
    %211 = arith.select %208, %206, %210 : vector<32x64xi1>, vector<32x64xf32>
    %cst_81 = arith.constant 1.000000e+00 : f32
    %212 = vector.broadcast %cst_81 : f32 to vector<32x64xf32>
    %213 = arith.addf %212, %211 : vector<32x64xf32>
    %214 = arith.mulf %177, %213 : vector<32x64xf32>
    %c0_82 = arith.constant 0 : index
    %c0_83 = arith.constant 0 : index
    %215 = vector.load %arg11[%c0_82, %c0_83] : memref<64x16xf32, #tpu.memory_space<vmem>>, vector<64x16xf32>
    %cst_84 = arith.constant dense<0.000000e+00> : vector<32x16xf32>
    %216 = tpu.matmul %214, %215, %cst_84 {dimension_numbers = #tpu.dot_dimension_numbers<[1], [0], [0], [1], [0, 0, 1, 1], [], []>} : vector<32x64xf32>, vector<64x16xf32>, vector<32x16xf32> -> vector<32x16xf32>
    %c0_85 = arith.constant 0 : index
    %c0_86 = arith.constant 0 : index
    %217 = vector.load %arg12[%c0_85, %c0_86] : memref<32x16xf32, #tpu.memory_space<vmem>>, vector<32x16xf32>
    tpu.vector_store %arg12[%c0_85, %c0_86], %216 {strides = array<i32>} : memref<32x16xf32, #tpu.memory_space<vmem>>, vector<32x16xf32>,
    return
  }
  func.func @transform_0(%arg0: i32) -> (i32, i32) {
    %c0_i32 = arith.constant 0 : i32
    %c0_i32_0 = arith.constant 0 : i32
    %c0_i32_1 = arith.constant 0 : i32
    return %c0_i32, %c0_i32_0 : i32, i32
  }
  func.func @transform_1(%arg0: i32) -> (i32, i32) {
    %c0_i32 = arith.constant 0 : i32
    %c0_i32_0 = arith.constant 0 : i32
    %c0_i32_1 = arith.constant 0 : i32
    return %c0_i32, %c0_i32_0 : i32, i32
  }
  func.func @transform_2(%arg0: i32) -> (i32, i32) {
    %c0_i32 = arith.constant 0 : i32
    %c0_i32_0 = arith.constant 0 : i32
    %c0_i32_1 = arith.constant 0 : i32
    return %c0_i32, %c0_i32_0 : i32, i32
  }
  func.func @transform_4(%arg0: i32) -> (i32, i32) {
    %c0_i32 = arith.constant 0 : i32
    %c0_i32_0 = arith.constant 0 : i32
    %c0_i32_1 = arith.constant 0 : i32
    return %c0_i32, %c0_i32_0 : i32, i32
  }
  func.func @transform_5(%arg0: i32) -> (i32, i32) {
    %c0_i32 = arith.constant 0 : i32
    %c0_i32_0 = arith.constant 0 : i32
    %c0_i32_1 = arith.constant 0 : i32
    return %c0_i32, %c0_i32_0 : i32, i32
  }
  func.func @transform_6(%arg0: i32) -> (i32, i32) {
    %c0_i32 = arith.constant 0 : i32
    %c0_i32_0 = arith.constant 0 : i32
    %c0_i32_1 = arith.constant 0 : i32
    return %c0_i32, %c0_i32_0 : i32, i32
  }
  func.func @transform_7(%arg0: i32) -> (i32, i32) {
    %c0_i32 = arith.constant 0 : i32
    %c0_i32_0 = arith.constant 0 : i32
    %c0_i32_1 = arith.constant 0 : i32
    return %c0_i32, %c0_i32_0 : i32, i32
  }
  func.func @transform_8(%arg0: i32) -> (i32, i32) {
    %c0_i32 = arith.constant 0 : i32
    %c0_i32_0 = arith.constant 0 : i32
    %c0_i32_1 = arith.constant 0 : i32
    return %c0_i32, %c0_i32_0 : i32, i32
  }
  func.func @transform_9(%arg0: i32) -> (i32, i32) {
    %c0_i32 = arith.constant 0 : i32
    %c0_i32_0 = arith.constant 0 : i32
    %c0_i32_1 = arith.constant 0 : i32
    return %c0_i32, %c0_i32_0 : i32, i32
  }
  func.func @transform_10(%arg0: i32) -> (i32, i32) {
    %c0_i32 = arith.constant 0 : i32
    %c0_i32_0 = arith.constant 0 : i32
    %c0_i32_1 = arith.constant 0 : i32
    return %c0_i32, %c0_i32_0 : i32, i32
  }
  func.func @transform_11(%arg0: i32) -> (i32, i32) {
    %c0_i32 = arith.constant 0 : i32
    %c0_i32_0 = arith.constant 0 : i32
    %c0_i32_1 = arith.constant 0 : i32
    return %c0_i32, %c0_i32_0 : i32, i32
  }
}

</mosaic_0001>

<bundles_post_ra>
// kernel: tpu_custom_call.1
= control target key start
LH: loop header
LB: loop body
LE: loop exit
PB: predicated region body
PF: predicated region fallthrough
CT: control target
= control target key end

     0   :  { %s2983_s0 = inlined_call_operand.vmem [shape: bf16[32,64], index: 0, kind: input, shape index: {}]   ;;  %s2984_s1 = inlined_call_operand.vmem [shape: bf16[64,256], index: 1, kind: input, shape index: {}]   ;;  %s2985_s2 = inlined_call_operand.vmem [shape: f32[1,256], index: 2, kind: input, shape index: {}]   ;;  %s2986_s3 = inlined_call_operand.vmem [shape: bf16[2,128,256], index: 3, kind: input, shape index: {}]   ;;  %s2987_s4 = inlined_call_operand.vmem [shape: f32[1,512], index: 4, kind: input, shape index: {}]   ;;  %s2988_s5 = inlined_call_operand.vmem [shape: f32[8,8], index: 5, kind: input, shape index: {}]   ;;  %s2989_s6 = inlined_call_operand.vmem [shape: f32[8,8], index: 6, kind: input, shape index: {}]   ;;  %s2990_s7 = inlined_call_operand.vmem [shape: f32[512,8], index: 7, kind: input, shape index: {}]   ;;  %s2991_s8 = inlined_call_operand.vmem [shape: f32[8,512], index: 8, kind: input, shape index: {}]   ;;  %s2992_s9 = inlined_call_operand.vmem [shape: bf16[32,256], index: 9, kind: input, shape index: {}]   ;;  %s2993_s10 = inlined_call_operand.vmem [shape: f32[64,16], index: 10, kind: input, shape index: {}]   ;;  %s2994_s11 = inlined_call_operand.vmem [shape: f32[32,16], index: 11, kind: output, shape index: {}]  }
   0x1   :  { %v47_v0 = vld [vmem:[%s2986_s3] sm:$0xff]  ;;  %v49_v1 = vld [vmem:[%s2986_s3 + $0x8] sm:$0xff]  ;;  %v51_v2 = vld [vmem:[%s2986_s3 + $0x10] sm:$0xff] }
   0x2   :  { %48 = vst [vmem:[#allocation2] sm:$0xff] %v47_v0  ;;  %v53_v3 = vld [vmem:[%s2986_s3 + $0x18] sm:$0xff]  ;;  %v55_v4 = vld [vmem:[%s2986_s3 + $0x20] sm:$0xff]  ;;  %v57_v5 = vld [vmem:[%s2986_s3 + $0x28] sm:$0xff] }
   0x3   :  { %50 = vst [vmem:[#allocation2 + $0x8] sm:$0xff] %v49_v1  ;;  %v59_v6 = vld [vmem:[%s2986_s3 + $0x30] sm:$0xff]  ;;  %v61_v7 = vld [vmem:[%s2986_s3 + $0x38] sm:$0xff]  ;;  %v63_v8 = vld [vmem:[%s2986_s3 + $0x40] sm:$0xff] }
   0x4   :  { %52 = vst [vmem:[#allocation2 + $0x10] sm:$0xff] %v51_v2  ;;  %v65_v9 = vld [vmem:[%s2986_s3 + $0x48] sm:$0xff]  ;;  %v67_v10 = vld [vmem:[%s2986_s3 + $0x50] sm:$0xff]  ;;  %v69_v11 = vld [vmem:[%s2986_s3 + $0x58] sm:$0xff] }
   0x5   :  { %54 = vst [vmem:[#allocation2 + $0x18] sm:$0xff] %v53_v3  ;;  %v71_v12 = vld [vmem:[%s2986_s3 + $0x60] sm:$0xff]  ;;  %v73_v13 = vld [vmem:[%s2986_s3 + $0x68] sm:$0xff]  ;;  %v75_v14 = vld [vmem:[%s2986_s3 + $0x70] sm:$0xff] }
   0x6   :  { %56 = vst [vmem:[#allocation2 + $0x20] sm:$0xff] %v55_v4  ;;  %v77_v15 = vld [vmem:[%s2986_s3 + $0x78] sm:$0xff]  ;;  %v79_v16 = vld [vmem:[%s2986_s3 + $0x80] sm:$0xff]  ;;  %v81_v17 = vld [vmem:[%s2986_s3 + $0x88] sm:$0xff] }
   0x7   :  { %58 = vst [vmem:[#allocation2 + $0x28] sm:$0xff] %v57_v5  ;;  %v83_v18 = vld [vmem:[%s2986_s3 + $0x90] sm:$0xff]  ;;  %v85_v19 = vld [vmem:[%s2986_s3 + $0x98] sm:$0xff]  ;;  %v87_v20 = vld [vmem:[%s2986_s3 + $0xa0] sm:$0xff] }
   0x8   :  { %60 = vst [vmem:[#allocation2 + $0x30] sm:$0xff] %v59_v6  ;;  %v89_v21 = vld [vmem:[%s2986_s3 + $0xa8] sm:$0xff]  ;;  %v91_v22 = vld [vmem:[%s2986_s3 + $0xb0] sm:$0xff]  ;;  %v93_v23 = vld [vmem:[%s2986_s3 + $0xb8] sm:$0xff] }
   0x9   :  { %62 = vst [vmem:[#allocation2 + $0x38] sm:$0xff] %v61_v7  ;;  %v95_v24 = vld [vmem:[%s2986_s3 + $0xc0] sm:$0xff]  ;;  %v97_v25 = vld [vmem:[%s2986_s3 + $0xc8] sm:$0xff]  ;;  %v99_v26 = vld [vmem:[%s2986_s3 + $0xd0] sm:$0xff] }
   0xa   :  { %64 = vst [vmem:[#allocation2 + $0x40] sm:$0xff] %v63_v8  ;;  %v101_v27 = vld [vmem:[%s2986_s3 + $0xd8] sm:$0xff]  ;;  %v103_v28 = vld [vmem:[%s2986_s3 + $0xe0] sm:$0xff]  ;;  %v105_v29 = vld [vmem:[%s2986_s3 + $0xe8] sm:$0xff] }
   0xb   :  { %66 = vst [vmem:[#allocation2 + $0x48] sm:$0xff] %v65_v9  ;;  %v107_v30 = vld [vmem:[%s2986_s3 + $0xf0] sm:$0xff]  ;;  %v109_v31 = vld [vmem:[%s2986_s3 + $0xf8] sm:$0xff] }
   0xc   :  { %68 = vst [vmem:[#allocation2 + $0x50] sm:$0xff] %v67_v10 }
   0xd   :  { %70 = vst [vmem:[#allocation2 + $0x58] sm:$0xff] %v69_v11 }
   0xe   :  { %72 = vst [vmem:[#allocation2 + $0x60] sm:$0xff] %v71_v12 }
   0xf   :  { %74 = vst [vmem:[#allocation2 + $0x68] sm:$0xff] %v73_v13 }
  0x10   :  { %76 = vst [vmem:[#allocation2 + $0x70] sm:$0xff] %v75_v14 }
  0x11   :  { %78 = vst [vmem:[#allocation2 + $0x78] sm:$0xff] %v77_v15 }
  0x12   :  { %80 = vst [vmem:[#allocation2 + $0x80] sm:$0xff] %v79_v16 }
  0x13   :  { %82 = vst [vmem:[#allocation2 + $0x88] sm:$0xff] %v81_v17 }
  0x14   :  { %84 = vst [vmem:[#allocation2 + $0x90] sm:$0xff] %v83_v18 }
  0x15   :  { %86 = vst [vmem:[#allocation2 + $0x98] sm:$0xff] %v85_v19 }
  0x16   :  { %88 = vst [vmem:[#allocation2 + $0xa0] sm:$0xff] %v87_v20 }
  0x17   :  { %90 = vst [vmem:[#allocation2 + $0xa8] sm:$0xff] %v89_v21 }
  0x18   :  { %92 = vst [vmem:[#allocation2 + $0xb0] sm:$0xff] %v91_v22 }
  0x19   :  { %94 = vst [vmem:[#allocation2 + $0xb8] sm:$0xff] %v93_v23 }
  0x1a   :  { %96 = vst [vmem:[#allocation2 + $0xc0] sm:$0xff] %v95_v24 }
  0x1b   :  { %98 = vst [vmem:[#allocation2 + $0xc8] sm:$0xff] %v97_v25 }
  0x1c   :  { %100 = vst [vmem:[#allocation2 + $0xd0] sm:$0xff] %v99_v26 }
  0x1d   :  { %102 = vst [vmem:[#allocation2 + $0xd8] sm:$0xff] %v101_v27 }
  0x1e   :  { %104 = vst [vmem:[#allocation2 + $0xe0] sm:$0xff] %v103_v28 }
  0x1f   :  { %106 = vst [vmem:[#allocation2 + $0xe8] sm:$0xff] %v105_v29 }
  0x20   :  { %108 = vst [vmem:[#allocation2 + $0xf0] sm:$0xff] %v107_v30 }
  0x21   :  { %110 = vst [vmem:[#allocation2 + $0xf8] sm:$0xff] %v109_v31 }
  0x22   :  { %116 = vsyncadd [#allocation3], 4096  ;;  %v1761_v32 = vld [vmem:[%s2984_s1 + $0x30] sm:$0xf]  ;;  %v1951_v33 = vld [vmem:[%s2984_s1 + $0x34] sm:$0xf0] }
  0x23   :  { %v1762_v34 = vor.u32 %v1951_v33, %v1761_v32  ;;  %v1950_v35 = vld [vmem:[%s2984_s1 + $0x34] sm:$0xf]  ;;  %v1763_v36 = vld [vmem:[%s2984_s1 + $0x38] sm:$0xf0]  ;;  %v1753_v37 = vld [vmem:[%s2984_s1 + $0x20] sm:$0xf] }
  0x24   :  { %v1766_v38 = vor.u32 %v1950_v35, %v1763_v36  ;;  %v1949_v39 = vld [vmem:[%s2984_s1 + $0x24] sm:$0xf0]  ;;  %v1948_v40 = vld [vmem:[%s2984_s1 + $0x24] sm:$0xf]  ;;  %v1755_v41 = vld [vmem:[%s2984_s1 + $0x28] sm:$0xf0] }
  0x25   :  { %196 = vmatpush.bf16.msra.mxu0 %v1762_v34  ;;  %v1754_v42 = vor.u32 %v1949_v39, %v1753_v37  ;;  %v1758_v43 = vor.u32 %v1948_v40, %v1755_v41  ;;  %v1745_v44 = vld [vmem:[%s2984_s1 + $0x10] sm:$0xf]  ;;  %v1947_v45 = vld [vmem:[%s2984_s1 + $0x14] sm:$0xf0]  ;;  %v1946_v46 = vld [vmem:[%s2984_s1 + $0x14] sm:$0xf] }
  0x26   :  { %215 = vmatpush.bf16.msra.mxu1 %v1766_v38  ;;  %v1747_v47 = vld [vmem:[%s2984_s1 + $0x18] sm:$0xf0]  ;;  %v1746_v48 = vor.u32 %v1947_v45, %v1745_v44  ;;  %v1737_v50 = vld [vmem:[%s2984_s1] sm:$0xf]  ;;  %v1945_v51 = vld [vmem:[%s2984_s1 + $0x4] sm:$0xf0] }
  0x27   :  { %v1750_v49 = vor.u32 %v1946_v46, %v1747_v47  ;;  %v1944_v52 = vld [vmem:[%s2984_s1 + $0x4] sm:$0xf]  ;;  %v1739_v53 = vld [vmem:[%s2984_s1 + $0x8] sm:$0xf0]  ;;  %v1738_v54 = vor.u32 %v1945_v51, %v1737_v50  ;;  %vm185_vm0 = vcmask 523264  }
  0x28   :  { %v1742_v55 = vor.u32 %v1944_v52, %v1739_v53  ;;  %v1942_v56 = vld [vmem:[%s2983_s0] sm:$0xff]  ;;  %v1943_v57 = vld [vmem:[%s2983_s0 + $0x8] sm:$0xff] }
  0x29   :  { %197 = vmatpush.bf16.msra.mxu0 %v1754_v42  ;;  %v129_v58 = vld [vmem:[%s2985_s2] sm:$0x3] }
  0x2a   :  { %216 = vmatpush.bf16.msra.mxu1 %v1758_v43  ;;  %v2313_v59 = vperm.slane %v129_v58, 0  ;;  %v2315_v60 = vperm.slane %v129_v58, 1 }
  0x2d   :  { %198 = vmatpush.bf16.msra.mxu0 %v1746_v48 }
  0x2e   :  { %217 = vmatpush.bf16.msra.mxu1 %v1750_v49 }
  0x31   :  { %199 = vmatpush.bf16.msra.mxu0 %v1738_v54 }
  0x32   :  { %218 = vmatpush.bf16.msra.mxu1 %v1742_v55 }
  0x34   :  { %1767 = vmatmul.msk.bf16.vlgmr.msra.gmra.mxu0 %vm185_vm0, %v1942_v56 }
  0x35   :  { %1769 = vmatmul.msk.bf16.vlgmr.msra.gmra.mxu1 %vm185_vm0, %v1942_v56 }
  0x44   :  { %1768 = vmatmul.msk.bf16.gmra.mxu0 %vm185_vm0, %v1943_v57 }
  0x45   :  { %1770 = vmatmul.msk.bf16.gmra.mxu1 %vm185_vm0, %v1943_v57 }
  0xb1   :  { %v201_v61 = vpop.f32.mrf.mxu0 }
  0xb2   :  { %v202_v62 = vadd.f32 %v201_v61, %v2313_v59  ;;  %v220_v63 = vpop.f32.mrf.mxu1 }
  0xb3   :  { %v2319_v0 = vadd.f32 %v220_v63, %v2315_v60 }
  0xb4   :  { %v2321_v1 = vmul.f32 0.70710677, %v202_v62  ;;  %v2364_v45 = vmul.f32 0.5, %v202_v62 }
  0xb5   :  { %v2324_v2 = vmul.f32 0.70710677, %v2319_v0 }
  0xb6   :  { %v246_v3 = vand.u32 2147483647, %v2321_v1  ;;  %vm398_vm1 = vcmp.ge.f32.partialorder %v2321_v1, 0.0 }
  0xb7   :  { %v247_v4 = vand.u32 2147483647, %v2324_v2  ;;  %vm399_vm2 = vcmp.ge.f32.partialorder %v2324_v2, 0.0 }
  0xb8   :  { %v254_v5 = vmul.f32 0.3275911, %v246_v3  ;;  %v350_v13 = vsub.f32 0.0, %v246_v3 }
  0xb9   :  { %v255_v6 = vmul.f32 0.3275911, %v247_v4  ;;  %v203_v7 = vpop.f32.mrf.mxu0  ;;  %v351_v15 = vsub.f32 0.0, %v247_v4 }
  0xba   :  { %v262_v8 = vadd.f32 1.0, %v254_v5  ;;  %v2329_v9 = vadd.f32 %v203_v7, %v2313_v59  ;;  %v222_v10 = vpop.f32.mrf.mxu1  ;;  %v358_v19 = vmul.f32 %v350_v13, %v246_v3 }
  0xbb   :  { %v263_v11 = vadd.f32 1.0, %v255_v6  ;;  %v2332_v12 = vadd.f32 %v222_v10, %v2315_v60  ;;  %v359_v21 = vmul.f32 %v351_v15, %v247_v4 }
  0xbc   :  { %1991 = vrcp.f32 %v262_v8  ;;  %v2335_v14 = vmul.f32 0.70710677, %v2329_v9  ;;  %v366_v32 = vmul.f32 1.442695, %v358_v19  ;;  %v2380_v19 = vmul.f32 0.5, %v2319_v0 }
  0xbd   :  { %1993 = vrcp.f32 %v263_v11  ;;  %v2338_v16 = vmul.f32 0.70710677, %v2332_v12  ;;  %v368_v35 = vmul.f32 1.442695, %v359_v21 }
  0xbe   :  { %v248_v17 = vand.u32 2147483647, %v2335_v14  ;;  %vm400_vm3 = vcmp.ge.f32.partialorder %v2335_v14, 0.0 }
  0xbf   :  { %v249_v18 = vand.u32 2147483647, %v2338_v16  ;;  %vm401_vm4 = vcmp.ge.f32.partialorder %v2338_v16, 0.0 }
  0xc0   :  { %v256_v20 = vmul.f32 0.3275911, %v248_v17  ;;  %v352_v38 = vsub.f32 0.0, %v248_v17 }
  0xc1   :  { %v257_v22 = vmul.f32 0.3275911, %v249_v18  ;;  %v206_v23 = vpop.f32.mrf.mxu0  ;;  %v353_v41 = vsub.f32 0.0, %v249_v18 }
  0xc2   :  { %v2342_v24 = vpop.eup %1991  ;;  %v264_v25 = vadd.f32 1.0, %v256_v20  ;;  %v2345_v26 = vadd.f32 %v206_v23, %v2313_v59  ;;  %v225_v27 = vpop.f32.mrf.mxu1  ;;  %v360_v51 = vmul.f32 %v352_v38, %v248_v17  ;;  %v2388_v23 = vmul.f32 0.5, %v2329_v9 }
  0xc3   :  { %v2347_v28 = vpop.eup %1993  ;;  %v278_v29 = vmul.f32 1.0614054, %v2342_v24  ;;  %v265_v30 = vadd.f32 1.0, %v257_v22  ;;  %v2351_v31 = vadd.f32 %v225_v27, %v2315_v60  ;;  %v361_v56 = vmul.f32 %v353_v41, %v249_v18 }
  0xc4   :  { %v279_v33 = vmul.f32 1.0614054, %v2347_v28  ;;  %1995 = vrcp.f32 %v264_v25  ;;  %v2355_v36 = vmul.f32 0.70710677, %v2345_v26  ;;  %v370_v7 = vmul.f32 1.442695, %v360_v51 }
  0xc5   :  { %v286_v34 = vadd.f32 -1.4531521, %v278_v29  ;;  %1997 = vrcp.f32 %v265_v30  ;;  %v2358_v39 = vmul.f32 0.70710677, %v2351_v31  ;;  %v372_v15 = vmul.f32 1.442695, %v361_v56 }
  0xc6   :  { %v287_v37 = vadd.f32 -1.4531521, %v279_v33  ;;  %v250_v42 = vand.u32 2147483647, %v2355_v36  ;;  %1999 = vpow2.f32 %v366_v32  ;;  %vm402_vm5 = vcmp.ge.f32.partialorder %v2355_v36, 0.0 }
  0xc7   :  { %v294_v40 = vmul.f32 %v2342_v24, %v286_v34  ;;  %v251_v44 = vand.u32 2147483647, %v2358_v39  ;;  %2001 = vpow2.f32 %v368_v35  ;;  %vm403_vm6 = vcmp.ge.f32.partialorder %v2358_v39, 0.0 }
  0xc8   :  { %v295_v43 = vmul.f32 %v2347_v28, %v287_v37  ;;  %v258_v47 = vmul.f32 0.3275911, %v250_v42  ;;  %v354_v5 = vsub.f32 0.0, %v250_v42 }
  0xc9   :  { %v302_v46 = vadd.f32 1.4214138, %v294_v40  ;;  %v208_v48 = vpop.f32.mrf.mxu0  ;;  %v259_v52 = vmul.f32 0.3275911, %v251_v44  ;;  %v355_v17 = vsub.f32 0.0, %v251_v44 }
  0xca   :  { %v2366_v49 = vpop.eup %1995  ;;  %v303_v50 = vadd.f32 1.4214138, %v295_v43  ;;  %v266_v57 = vadd.f32 1.0, %v258_v47  ;;  %v2375_v63 = vadd.f32 %v208_v48, %v2313_v59  ;;  %v362_v27 = vmul.f32 %v354_v5, %v250_v42 }
  0xcb   :  { %v2368_v53 = vpop.eup %1997  ;;  %v310_v54 = vmul.f32 %v2342_v24, %v302_v46  ;;  %v280_v55 = vmul.f32 1.0614054, %v2366_v49  ;;  %v267_v62 = vadd.f32 1.0, %v259_v52  ;;  %v363_v9 = vmul.f32 %v355_v17, %v251_v44  ;;  %v227_v44 = vpop.f32.mrf.mxu1 }
  0xcc   :  { %v311_v58 = vmul.f32 %v2347_v28, %v303_v50  ;;  %v281_v61 = vmul.f32 1.0614054, %v2368_v53  ;;  %2003 = vrcp.f32 %v266_v57  ;;  %v2000_v10 = vpop.eup %1999  ;;  %v2385_v21 = vmul.f32 0.70710677, %v2375_v63 }
  0xcd   :  { %v318_v3 = vadd.f32 -0.28449672, %v310_v54  ;;  %v288_v4 = vadd.f32 -1.4531521, %v280_v55  ;;  %2005 = vrcp.f32 %v267_v62  ;;  %v2002_v18 = vpop.eup %2001  ;;  %v374_v46 = vmul.f32 1.442695, %v362_v27 }
  0xce   :  { %v319_v6 = vadd.f32 -0.28449672, %v311_v58  ;;  %v289_v8 = vadd.f32 -1.4531521, %v281_v61  ;;  %2007 = vpow2.f32 %v370_v7  ;;  %v2392_v0 = vand.u32 2147483647, %v2385_v21 }
  0xcf   :  { %v326_v11 = vmul.f32 %v2342_v24, %v318_v3  ;;  %v296_v13 = vmul.f32 %v2366_v49, %v288_v4  ;;  %2009 = vpow2.f32 %v372_v15  ;;  %v376_v55 = vmul.f32 1.442695, %v363_v9 }
  0xd0   :  { %v327_v59 = vmul.f32 %v2347_v28, %v319_v6  ;;  %v297_v20 = vmul.f32 %v2368_v53, %v289_v8  ;;  %v260_v41 = vmul.f32 0.3275911, %v2392_v0  ;;  %v2411_v6 = vadd.f32 %v227_v44, %v2315_v60 }
  0xd1   :  { %v334_v22 = vadd.f32 0.2548296, %v326_v11  ;;  %v304_v25 = vadd.f32 1.4214138, %v296_v13  ;;  %v356_v2 = vsub.f32 0.0, %v2392_v0  ;;  %vm404_vm7 = vcmp.ge.f32.partialorder %v2385_v21, 0.0 }
  0xd2   :  { %v335_v29 = vadd.f32 0.2548296, %v327_v59  ;;  %v305_v30 = vadd.f32 1.4214138, %v297_v20  ;;  %v2394_v32 = vpop.eup %2003  ;;  %v268_v51 = vadd.f32 1.0, %v260_v41 }
  0xd3   :  { %v342_v33 = vmul.f32 %v2342_v24, %v334_v22  ;;  %v312_v34 = vmul.f32 %v2366_v49, %v304_v25  ;;  %v2399_v35 = vpop.eup %2005  ;;  %v282_v40 = vmul.f32 1.0614054, %v2394_v32  ;;  %v2423_v27 = vmul.f32 0.70710677, %v2411_v6 }
  0xd4   :  { %v343_v37 = vmul.f32 %v2347_v28, %v335_v29  ;;  %v313_v38 = vmul.f32 %v2368_v53, %v305_v30  ;;  %v283_v24 = vmul.f32 1.0614054, %v2399_v35  ;;  %v2008_v56 = vpop.eup %2007  ;;  %2011 = vrcp.f32 %v268_v51 }
  0xd5   :  { %v382_v42 = vmul.f32 %v2000_v10, %v342_v33  ;;  %v320_v43 = vadd.f32 -0.28449672, %v312_v34  ;;  %v290_v50 = vadd.f32 -1.4531521, %v282_v40  ;;  %v2010_v62 = vpop.eup %2009  ;;  %2013 = vpow2.f32 %v374_v46 }
  0xd6   :  { %v383_v47 = vmul.f32 %v2002_v18, %v343_v37  ;;  %v321_v48 = vadd.f32 -0.28449672, %v313_v38  ;;  %v291_v28 = vadd.f32 -1.4531521, %v283_v24  ;;  %2015 = vpow2.f32 %v376_v55 }
  0xd7   :  { %v390_v52 = vsub.f32 1.0, %v382_v42  ;;  %v328_v54 = vmul.f32 %v2366_v49, %v320_v43  ;;  %v298_v61 = vmul.f32 %v2394_v32, %v290_v50  ;;  %v253_v40 = vand.u32 2147483647, %v2423_v27 }
  0xd8   :  { %v391_v57 = vsub.f32 1.0, %v383_v47  ;;  %v329_v58 = vmul.f32 %v2368_v53, %v321_v48  ;;  %v299_v5 = vmul.f32 %v2399_v35, %v291_v28  ;;  %v364_v44 = vmul.f32 %v356_v2, %v2392_v0 }
  0xd9   :  { %v406_v3 = vsub.f32 0.0, %v390_v52  ;;  %v336_v4 = vadd.f32 0.2548296, %v328_v54  ;;  %v306_v10 = vadd.f32 1.4214138, %v298_v61  ;;  %vm405_vm8 = vcmp.ge.f32.partialorder %v2423_v27, 0.0 }
  0xda   :  { %v407_v7 = vsub.f32 0.0, %v391_v57  ;;  %v337_v8 = vadd.f32 0.2548296, %v329_v58  ;;  %v307_v15 = vadd.f32 1.4214138, %v299_v5  ;;  %v2425_v1 = vpop.eup %2011 }
  0xdb   :  { %v414_v11 = vsel %vm398_vm1, %v390_v52, %v406_v3  ;;  %v344_v13 = vmul.f32 %v2366_v49, %v336_v4  ;;  %v314_v60 = vmul.f32 %v2394_v32, %v306_v10  ;;  %v284_v9 = vmul.f32 1.0614054, %v2425_v1  ;;  %v2014_v41 = vpop.eup %2013 }
  0xdc   :  { %v422_v17 = vadd.f32 1.0, %v414_v11  ;;  %v415_v18 = vsel %vm399_vm2, %v391_v57, %v407_v7  ;;  %v345_v59 = vmul.f32 %v2368_v53, %v337_v8  ;;  %v315_v25 = vmul.f32 %v2399_v35, %v307_v15  ;;  %v2016_v61 = vpop.eup %2015 }
  0xdd   :  { %v423_v20 = vadd.f32 1.0, %v415_v18  ;;  %v384_v22 = vmul.f32 %v2008_v56, %v344_v13  ;;  %v322_v30 = vadd.f32 -0.28449672, %v314_v60  ;;  %v292_v46 = vadd.f32 -1.4531521, %v284_v9 }
  0xde   :  { %v430_v49 = vmul.f32 %v422_v17, %v2364_v45  ;;  %v385_v29 = vmul.f32 %v2010_v62, %v345_v59  ;;  %v323_v34 = vadd.f32 -0.28449672, %v315_v25  ;;  %v261_v47 = vmul.f32 0.3275911, %v253_v40 }
  0xdf   :  { %v431_v33 = vmul.f32 %v423_v20, %v2380_v19  ;;  %v392_v53 = vsub.f32 1.0, %v384_v22  ;;  %v330_v38 = vmul.f32 %v2394_v32, %v322_v30  ;;  %v300_v51 = vmul.f32 %v2425_v1, %v292_v46 }
  0xe0   :  { %v393_v37 = vsub.f32 1.0, %v385_v29  ;;  %v331_v43 = vmul.f32 %v2399_v35, %v323_v34  ;;  %v269_v55 = vadd.f32 1.0, %v261_v47  ;;  %v233_v56 = vmul.f32 0.5, %v2332_v12 }
  0xe1   :  { %v2433_v42 = vpack.c.bf16 %v431_v33, %v430_v49  ;;  %v408_v45 = vsub.f32 0.0, %v392_v53  ;;  %v338_v24 = vadd.f32 0.2548296, %v330_v38  ;;  %v308_v58 = vadd.f32 1.4214138, %v300_v51 }
  0xe2   :  { %v409_v19 = vsub.f32 0.0, %v393_v37  ;;  %v339_v50 = vadd.f32 0.2548296, %v331_v43  ;;  %2017 = vrcp.f32 %v269_v55  ;;  %v378_v7 = vmul.f32 1.442695, %v364_v44 }
  0xe3   :  { %v416_v48 = vsel %vm400_vm3, %v392_v53, %v408_v45  ;;  %v346_v28 = vmul.f32 %v2394_v32, %v338_v24  ;;  %v316_v0 = vmul.f32 %v2425_v1, %v308_v58  ;;  %v234_v11 = vmul.f32 0.5, %v2345_v26 }
  0xe4   :  { %v424_v52 = vadd.f32 1.0, %v416_v48  ;;  %v417_v54 = vsel %vm401_vm4, %v393_v37, %v409_v19  ;;  %v347_v16 = vmul.f32 %v2399_v35, %v339_v50  ;;  %2019 = vpow2.f32 %v378_v7 }
  0xe5   :  { %v425_v57 = vadd.f32 1.0, %v417_v54  ;;  %v386_v62 = vmul.f32 %v2014_v41, %v346_v28  ;;  %v324_v10 = vadd.f32 -0.28449672, %v316_v0  ;;  %v357_v17 = vsub.f32 0.0, %v253_v40 }
  0xe6   :  { %v432_v14 = vmul.f32 %v424_v52, %v2388_v23  ;;  %v387_v4 = vmul.f32 %v2016_v61, %v347_v16  ;;  %v235_v22 = vmul.f32 0.5, %v2351_v31  ;;  %v236_v50 = vmul.f32 0.5, %v2375_v63 }
  0xe7   :  { %v433_v3 = vmul.f32 %v425_v57, %v233_v56  ;;  %v394_v5 = vsub.f32 1.0, %v386_v62  ;;  %v332_v23 = vmul.f32 %v2425_v1, %v324_v10  ;;  %v365_v30 = vmul.f32 %v357_v17, %v253_v40 }
  0xe8   :  { %v395_v32 = vsub.f32 1.0, %v387_v4  ;;  %v2018_v13 = vpop.eup %2017  ;;  %v237_v52 = vmul.f32 0.5, %v2411_v6 }
  0xe9   :  { %v2446_v8 = vpack.c.bf16 %v433_v3, %v432_v14  ;;  %v410_v12 = vsub.f32 0.0, %v394_v5  ;;  %v340_v60 = vadd.f32 0.2548296, %v332_v23  ;;  %v285_v20 = vmul.f32 1.0614054, %v2018_v13 }
  0xea   :  { %v411_v35 = vsub.f32 0.0, %v395_v32  ;;  %v2020_v33 = vpop.eup %2019  ;;  %v380_v9 = vmul.f32 1.442695, %v365_v30 }
  0xeb   :  { %v418_v15 = vsel %vm402_vm5, %v394_v5, %v410_v12  ;;  %v348_v26 = vmul.f32 %v2425_v1, %v340_v60  ;;  %v293_v36 = vadd.f32 -1.4531521, %v285_v20 }
  0xec   :  { %v426_v18 = vadd.f32 1.0, %v418_v15  ;;  %v419_v59 = vsel %vm403_vm6, %v395_v32, %v411_v35  ;;  %2021 = vpow2.f32 %v380_v9 }
  0xed   :  { %v427_v25 = vadd.f32 1.0, %v419_v59  ;;  %v301_v2 = vmul.f32 %v2018_v13, %v293_v36  ;;  %v388_v39 = vmul.f32 %v2020_v33, %v348_v26 }
  0xee   :  { %v434_v49 = vmul.f32 %v426_v18, %v234_v11 }
  0xef   :  { %v435_v29 = vmul.f32 %v427_v25, %v235_v22  ;;  %v309_v34 = vadd.f32 1.4214138, %v301_v2  ;;  %v396_v38 = vsub.f32 1.0, %v388_v39 }
  0xf1   :  { %v2454_v53 = vpack.c.bf16 %v435_v29, %v434_v49  ;;  %v317_v37 = vmul.f32 %v2018_v13, %v309_v34  ;;  %v412_v31 = vsub.f32 0.0, %v396_v38 }
  0xf2   :  { %v2022_v19 = vpop.eup %2021 }
  0xf3   :  { %v325_v41 = vadd.f32 -0.28449672, %v317_v37  ;;  %v420_v1 = vsel %vm404_vm7, %v396_v38, %v412_v31 }
  0xf4   :  { %v428_v47 = vadd.f32 1.0, %v420_v1 }
  0xf5   :  { %v333_v45 = vmul.f32 %v2018_v13, %v325_v41 }
  0xf6   :  { %v436_v44 = vmul.f32 %v428_v47, %v236_v50 }
  0xf7   :  { %v341_v43 = vadd.f32 0.2548296, %v333_v45 }
  0xf9   :  { %v349_v46 = vmul.f32 %v2018_v13, %v341_v43 }
  0xfb   :  { %v389_v40 = vmul.f32 %v2022_v19, %v349_v46 }
  0xfd   :  { %v397_v24 = vsub.f32 1.0, %v389_v40 }
  0xff   :  { %v413_v48 = vsub.f32 0.0, %v397_v24 }
 0x101   :  { %v421_v51 = vsel %vm405_vm8, %v397_v24, %v413_v48 }
 0x102   :  { %v429_v54 = vadd.f32 1.0, %v421_v51 }
 0x104   :  { %v437_v28 = vmul.f32 %v429_v54, %v237_v52 }
 0x106   :  { %v2460_v55 = vpack.c.bf16 %v437_v28, %v436_v44 }
 0x107   :  { %2092 = dma.done.wait [#allocation3], 4096 }
 0x108   :  { %2093 = vsyncadd [#allocation3], 4294963200  ;;  %v1829_v21 = vld [vmem:[#allocation2 + $0x70] sm:$0xf]  ;;  %v1967_v56 = vld [vmem:[#allocation2 + $0x74] sm:$0xf0] }
 0x109   :  { %v1966_v57 = vld [vmem:[#allocation2 + $0x74] sm:$0xf]  ;;  %v1830_v16 = vor.u32 %v1967_v56, %v1829_v21  ;;  %v1831_v58 = vld [vmem:[#allocation2 + $0x78] sm:$0xf0]  ;;  %v1893_v61 = vld [vmem:[#allocation2 + $0xf0] sm:$0xf] }
 0x10a   :  { %v1983_v14 = vld [vmem:[#allocation2 + $0xf4] sm:$0xf0]  ;;  %v1834_v63 = vor.u32 %v1966_v57, %v1831_v58  ;;  %v1982_v27 = vld [vmem:[#allocation2 + $0xf4] sm:$0xf]  ;;  %v1895_v3 = vld [vmem:[#allocation2 + $0xf8] sm:$0xf0] }
 0x10b   :  { %v1894_v62 = vor.u32 %v1983_v14, %v1893_v61  ;;  %v1821_v4 = vld [vmem:[#allocation2 + $0x60] sm:$0xf]  ;;  %555 = vmatpush.bf16.msra.mxu2 %v1830_v16  ;;  %v1898_v6 = vor.u32 %v1982_v27, %v1895_v3  ;;  %v1965_v0 = vld [vmem:[#allocation2 + $0x64] sm:$0xf0]  ;;  %v1964_v5 = vld [vmem:[#allocation2 + $0x64] sm:$0xf] }
 0x10c   :  { %v1823_v7 = vld [vmem:[#allocation2 + $0x68] sm:$0xf0]  ;;  %574 = vmatpush.bf16.msra.mxu3 %v1834_v63  ;;  %v1822_v32 = vor.u32 %v1965_v0, %v1821_v4  ;;  %v1885_v12 = vld [vmem:[#allocation2 + $0xe0] sm:$0xf]  ;;  %v1981_v11 = vld [vmem:[#allocation2 + $0xe4] sm:$0xf0] }
 0x10d   :  { %698 = vmatpush.bf16.msrb.mxu0 %v1894_v62  ;;  %v1826_v10 = vor.u32 %v1964_v5, %v1823_v7  ;;  %v1980_v35 = vld [vmem:[#allocation2 + $0xe4] sm:$0xf]  ;;  %717 = vmatpush.bf16.msrb.mxu1 %v1898_v6  ;;  %v1886_v23 = vor.u32 %v1981_v11, %v1885_v12  ;;  %v1887_v13 = vld [vmem:[#allocation2 + $0xe8] sm:$0xf0]  ;;  %v1813_v15 = vld [vmem:[#allocation2 + $0x50] sm:$0xf] }
 0x10e   :  { %v1963_v17 = vld [vmem:[#allocation2 + $0x54] sm:$0xf0]  ;;  %v1890_v18 = vor.u32 %v1980_v35, %v1887_v13  ;;  %v1962_v59 = vld [vmem:[#allocation2 + $0x54] sm:$0xf]  ;;  %v1815_v60 = vld [vmem:[#allocation2 + $0x58] sm:$0xf0] }
 0x10f   :  { %v1877_v20 = vld [vmem:[#allocation2 + $0xd0] sm:$0xf]  ;;  %556 = vmatpush.bf16.msra.mxu2 %v1822_v32  ;;  %v1814_v22 = vor.u32 %v1963_v17, %v1813_v15  ;;  %v1979_v25 = vld [vmem:[#allocation2 + $0xd4] sm:$0xf0]  ;;  %v1978_v49 = vld [vmem:[#allocation2 + $0xd4] sm:$0xf]  ;;  %v1818_v36 = vor.u32 %v1962_v59, %v1815_v60 }
 0x110   :  { %v1879_v26 = vld [vmem:[#allocation2 + $0xd8] sm:$0xf0]  ;;  %575 = vmatpush.bf16.msra.mxu3 %v1826_v10  ;;  %v1878_v29 = vor.u32 %v1979_v25, %v1877_v20  ;;  %v1805_v30 = vld [vmem:[#allocation2 + $0x40] sm:$0xf]  ;;  %v1961_v2 = vld [vmem:[#allocation2 + $0x44] sm:$0xf0] }
 0x111   :  { %699 = vmatpush.bf16.msrb.mxu0 %v1886_v23  ;;  %v1960_v33 = vld [vmem:[#allocation2 + $0x44] sm:$0xf]  ;;  %718 = vmatpush.bf16.msrb.mxu1 %v1890_v18  ;;  %v1882_v39 = vor.u32 %v1978_v49, %v1879_v26  ;;  %v1807_v34 = vld [vmem:[#allocation2 + $0x48] sm:$0xf0]  ;;  %v1869_v9 = vld [vmem:[#allocation2 + $0xc0] sm:$0xf]  ;;  %v1806_v45 = vor.u32 %v1961_v2, %v1805_v30  ;;  %v467_v26 = vunpack.c.l.b16 %v2433_v42  ;;  %v610_v30 = vunpack.c.h.b16 %v2433_v42 }
 0x112   :  { %v1977_v37 = vld [vmem:[#allocation2 + $0xc4] sm:$0xf0]  ;;  %v1976_v38 = vld [vmem:[#allocation2 + $0xc4] sm:$0xf]  ;;  %v1871_v41 = vld [vmem:[#allocation2 + $0xc8] sm:$0xf0]  ;;  %v1810_v31 = vor.u32 %v1960_v33, %v1807_v34  ;;  %v611_v2 = vunpack.c.h.b16 %v2446_v8 }
 0x113   :  { %557 = vmatpush.bf16.msra.mxu2 %v1814_v22  ;;  %v1870_v43 = vor.u32 %v1977_v37, %v1869_v9  ;;  %v1797_v46 = vld [vmem:[#allocation2 + $0x30] sm:$0xf]  ;;  %v1959_v19 = vld [vmem:[#allocation2 + $0x34] sm:$0xf0]  ;;  %v1958_v1 = vld [vmem:[#allocation2 + $0x34] sm:$0xf]  ;;  %v1874_v40 = vor.u32 %v1976_v38, %v1871_v41 }
 0x114   :  { %576 = vmatpush.bf16.msra.mxu3 %v1818_v36  ;;  %v1799_v24 = vld [vmem:[#allocation2 + $0x38] sm:$0xf0]  ;;  %v1861_v47 = vld [vmem:[#allocation2 + $0xb0] sm:$0xf]  ;;  %v1975_v48 = vld [vmem:[#allocation2 + $0xb4] sm:$0xf0]  ;;  %v1798_v44 = vor.u32 %v1959_v19, %v1797_v46  ;;  %v468_v36 = vunpack.c.l.b16 %v2446_v8  ;;  %v614_v38 = vpack.c.b16 %v611_v2, %v610_v30 }
 0x115   :  { %700 = vmatpush.bf16.msrb.mxu0 %v1878_v29  ;;  %719 = vmatpush.bf16.msrb.mxu1 %v1882_v39  ;;  %v1974_v50 = vld [vmem:[#allocation2 + $0xb4] sm:$0xf]  ;;  %v1863_v51 = vld [vmem:[#allocation2 + $0xb8] sm:$0xf0]  ;;  %v1802_v52 = vor.u32 %v1958_v1, %v1799_v24  ;;  %v1862_v54 = vor.u32 %v1975_v48, %v1861_v47  ;;  %v1789_v28 = vld [vmem:[#allocation2 + $0x20] sm:$0xf] }
 0x116   :  { %v1957_v21 = vld [vmem:[#allocation2 + $0x24] sm:$0xf0]  ;;  %v1956_v56 = vld [vmem:[#allocation2 + $0x24] sm:$0xf]  ;;  %v1866_v57 = vor.u32 %v1974_v50, %v1863_v51  ;;  %v1791_v16 = vld [vmem:[#allocation2 + $0x28] sm:$0xf0]  ;;  %v471_v9 = vpack.c.b16 %v468_v36, %v467_v26 }
 0x117   :  { %558 = vmatpush.bf16.msra.mxu2 %v1806_v45  ;;  %v1853_v58 = vld [vmem:[#allocation2 + $0xa0] sm:$0xf]  ;;  %v1973_v61 = vld [vmem:[#allocation2 + $0xa4] sm:$0xf0]  ;;  %v1972_v14 = vld [vmem:[#allocation2 + $0xa4] sm:$0xf]  ;;  %v1790_v62 = vor.u32 %v1957_v21, %v1789_v28  ;;  %v1794_v27 = vor.u32 %v1956_v56, %v1791_v16  ;;  %v469_v28 = vunpack.c.l.b16 %v2454_v53  ;;  %v470_v21 = vunpack.c.l.b16 %v2460_v55 }
 0x118   :  { %577 = vmatpush.bf16.msra.mxu3 %v1810_v31  ;;  %v1855_v63 = vld [vmem:[#allocation2 + $0xa8] sm:$0xf0]  ;;  %v1854_v3 = vor.u32 %v1973_v61, %v1853_v58  ;;  %v1781_v4 = vld [vmem:[#allocation2 + $0x10] sm:$0xf]  ;;  %v1955_v6 = vld [vmem:[#allocation2 + $0x14] sm:$0xf0]  ;;  %v612_v16 = vunpack.c.h.b16 %v2454_v53  ;;  %v613_v58 = vunpack.c.h.b16 %v2460_v55 }
 0x119   :  { %701 = vmatpush.bf16.msrb.mxu0 %v1870_v43  ;;  %720 = vmatpush.bf16.msrb.mxu1 %v1874_v40  ;;  %v1954_v0 = vld [vmem:[#allocation2 + $0x14] sm:$0xf]  ;;  %v1858_v5 = vor.u32 %v1972_v14, %v1855_v63  ;;  %v1783_v7 = vld [vmem:[#allocation2 + $0x18] sm:$0xf0]  ;;  %v1845_v32 = vld [vmem:[#allocation2 + $0x90] sm:$0xf]  ;;  %v1782_v35 = vor.u32 %v1955_v6, %v1781_v4 }
 0x11a   :  { %v1971_v10 = vld [vmem:[#allocation2 + $0x94] sm:$0xf0]  ;;  %v1970_v12 = vld [vmem:[#allocation2 + $0x94] sm:$0xf]  ;;  %v1847_v11 = vld [vmem:[#allocation2 + $0x98] sm:$0xf0]  ;;  %v1786_v23 = vor.u32 %v1954_v0, %v1783_v7  ;;  %v615_v6 = vpack.c.b16 %v613_v58, %v612_v16 }
 0x11b   :  { %559 = vmatpush.bf16.msra.mxu2 %v1798_v44  ;;  %v1846_v13 = vor.u32 %v1971_v10, %v1845_v32  ;;  %v1773_v15 = vld [vmem:[#allocation2] sm:$0xf]  ;;  %v1953_v17 = vld [vmem:[#allocation2 + $0x4] sm:$0xf0]  ;;  %v1952_v18 = vld [vmem:[#allocation2 + $0x4] sm:$0xf]  ;;  %v1850_v59 = vor.u32 %v1970_v12, %v1847_v11 }
 0x11c   :  { %578 = vmatpush.bf16.msra.mxu3 %v1802_v52  ;;  %v1775_v60 = vld [vmem:[#allocation2 + $0x8] sm:$0xf0]  ;;  %v1837_v20 = vld [vmem:[#allocation2 + $0x80] sm:$0xf]  ;;  %v1969_v22 = vld [vmem:[#allocation2 + $0x84] sm:$0xf0]  ;;  %v1774_v29 = vor.u32 %v1953_v17, %v1773_v15 }
 0x11d   :  { %702 = vmatpush.bf16.msrb.mxu0 %v1862_v54  ;;  %721 = vmatpush.bf16.msrb.mxu1 %v1866_v57  ;;  %v1968_v25 = vld [vmem:[#allocation2 + $0x84] sm:$0xf]  ;;  %v1839_v49 = vld [vmem:[#allocation2 + $0x88] sm:$0xf0]  ;;  %v1778_v33 = vor.u32 %v1952_v18, %v1775_v60  ;;  %v1838_v39 = vor.u32 %v1969_v22, %v1837_v20  ;;  %v825_v37 = vld [vmem:[%s2990_s7 + $0x178] sm:$0xff]  ;;  %vm1006_vm9 = vcmask 64512  }
 0x11e   :  { %v1842_v34 = vor.u32 %v1968_v25, %v1839_v49  ;;  %v841_v41 = vld [vmem:[%s2990_s7 + $0x1f8] sm:$0xff]  ;;  %v824_v42 = vld [vmem:[%s2990_s7 + $0x170] sm:$0xff]  ;;  %v823_v31 = vld [vmem:[%s2990_s7 + $0x168] sm:$0xff]  ;;  %vm1025_vm10 = vcmask 1040384   ;;  %vm1102_vm11 = vcmask 58368  }
 0x11f   :  { %560 = vmatpush.bf16.msra.mxu2 %v1790_v62  ;;  %v840_v8 = vld [vmem:[%s2990_s7 + $0x1f0] sm:$0xff]  ;;  %v793_v45 = vld [vmem:[%s2990_s7 + $0x78] sm:$0xff]  ;;  %v839_v46 = vld [vmem:[%s2990_s7 + $0x1e8] sm:$0xff] }
 0x120   :  { %579 = vmatpush.bf16.msra.mxu3 %v1794_v27  ;;  %v809_v43 = vld [vmem:[%s2990_s7 + $0xf8] sm:$0xff]  ;;  %v792_v19 = vld [vmem:[%s2990_s7 + $0x70] sm:$0xff]  ;;  %v822_v1 = vld [vmem:[%s2990_s7 + $0x160] sm:$0xff]  ;;  %v472_v27 = vpack.c.b16 %v470_v21, %v469_v28 }
 0x121   :  { %703 = vmatpush.bf16.msrb.mxu0 %v1854_v3  ;;  %722 = vmatpush.bf16.msrb.mxu1 %v1858_v5  ;;  %v808_v40 = vld [vmem:[%s2990_s7 + $0xf0] sm:$0xff]  ;;  %v838_v24 = vld [vmem:[%s2990_s7 + $0x1e0] sm:$0xff]  ;;  %v791_v47 = vld [vmem:[%s2990_s7 + $0x68] sm:$0xff] }
 0x122   :  { %v821_v48 = vld [vmem:[%s2990_s7 + $0x158] sm:$0xff]  ;;  %v807_v50 = vld [vmem:[%s2990_s7 + $0xe8] sm:$0xff]  ;;  %v790_v44 = vld [vmem:[%s2990_s7 + $0x60] sm:$0xff] }
 0x123   :  { %561 = vmatpush.bf16.msra.mxu2 %v1782_v35  ;;  %v837_v51 = vld [vmem:[%s2990_s7 + $0x1d8] sm:$0xff]  ;;  %v820_v52 = vld [vmem:[%s2990_s7 + $0x150] sm:$0xff]  ;;  %v806_v54 = vld [vmem:[%s2990_s7 + $0xe0] sm:$0xff] }
 0x124   :  { %580 = vmatpush.bf16.msra.mxu3 %v1786_v23  ;;  %v836_v56 = vld [vmem:[%s2990_s7 + $0x1d0] sm:$0xff]  ;;  %v789_v57 = vld [vmem:[%s2990_s7 + $0x58] sm:$0xff]  ;;  %v819_v61 = vld [vmem:[%s2990_s7 + $0x148] sm:$0xff] }
 0x125   :  { %704 = vmatpush.bf16.msrb.mxu0 %v1846_v13  ;;  %723 = vmatpush.bf16.msrb.mxu1 %v1850_v59  ;;  %v805_v14 = vld [vmem:[%s2990_s7 + $0xd8] sm:$0xff]  ;;  %v835_v63 = vld [vmem:[%s2990_s7 + $0x1c8] sm:$0xff]  ;;  %v788_v53 = vld [vmem:[%s2990_s7 + $0x50] sm:$0xff] }
 0x126   :  { %v818_v55 = vld [vmem:[%s2990_s7 + $0x140] sm:$0xff]  ;;  %v804_v62 = vld [vmem:[%s2990_s7 + $0xd0] sm:$0xff]  ;;  %v787_v4 = vld [vmem:[%s2990_s7 + $0x48] sm:$0xff] }
 0x127   :  { %562 = vmatpush.bf16.msra.mxu2 %v1774_v29  ;;  %v834_v3 = vld [vmem:[%s2990_s7 + $0x1c0] sm:$0xff]  ;;  %v817_v0 = vld [vmem:[%s2990_s7 + $0x138] sm:$0xff]  ;;  %v803_v5 = vld [vmem:[%s2990_s7 + $0xc8] sm:$0xff] }
 0x128   :  { %581 = vmatpush.bf16.msra.mxu3 %v1778_v33  ;;  %v833_v7 = vld [vmem:[%s2990_s7 + $0x1b8] sm:$0xff]  ;;  %v816_v32 = vld [vmem:[%s2990_s7 + $0x130] sm:$0xff]  ;;  %v786_v10 = vld [vmem:[%s2990_s7 + $0x40] sm:$0xff] }
 0x129   :  { %705 = vmatpush.bf16.msrb.mxu0 %v1838_v39  ;;  %724 = vmatpush.bf16.msrb.mxu1 %v1842_v34  ;;  %v802_v12 = vld [vmem:[%s2990_s7 + $0xc0] sm:$0xff]  ;;  %v832_v11 = vld [vmem:[%s2990_s7 + $0x1b0] sm:$0xff]  ;;  %v815_v35 = vld [vmem:[%s2990_s7 + $0x128] sm:$0xff] }
 0x12a   :  { %563 = vmatmul.bf16.vlgmr.msra.gmra.mxu2 %v471_v9  ;;  %v785_v23 = vld [vmem:[%s2990_s7 + $0x38] sm:$0xff]  ;;  %v831_v15 = vld [vmem:[%s2990_s7 + $0x1a8] sm:$0xff]  ;;  %v814_v17 = vld [vmem:[%s2990_s7 + $0x120] sm:$0xff] }
 0x12b   :  { %582 = vmatmul.bf16.vlgmr.msra.gmra.mxu3 %v471_v9  ;;  %842 = vmatpush.msrb.mxu2 %v793_v45  ;;  %v801_v13 = vld [vmem:[%s2990_s7 + $0xb8] sm:$0xff]  ;;  %v784_v18 = vld [vmem:[%s2990_s7 + $0x30] sm:$0xff]  ;;  %v830_v60 = vld [vmem:[%s2990_s7 + $0x1a0] sm:$0xff] }
 0x12c   :  { %706 = vmatmul.bf16.vlgmr.msrb.gmra.mxu0 %v614_v38  ;;  %725 = vmatmul.bf16.vlgmr.msrb.gmra.mxu1 %v614_v38  ;;  %v800_v59 = vld [vmem:[%s2990_s7 + $0xb0] sm:$0xff]  ;;  %v813_v20 = vld [vmem:[%s2990_s7 + $0x118] sm:$0xff]  ;;  %v783_v22 = vld [vmem:[%s2990_s7 + $0x28] sm:$0xff] }
 0x12d   :  { %924 = vmatpush.msra.mxu0 %v825_v37  ;;  %965 = vmatpush.msra.mxu1 %v841_v41  ;;  %v799_v25 = vld [vmem:[%s2990_s7 + $0xa8] sm:$0xff]  ;;  %v829_v49 = vld [vmem:[%s2990_s7 + $0x198] sm:$0xff]  ;;  %v812_v26 = vld [vmem:[%s2990_s7 + $0x110] sm:$0xff] }
 0x12e   :  { %883 = vmatpush.msrb.mxu3 %v809_v43  ;;  %843 = vmatpush.msrb.mxu2 %v792_v19  ;;  %v828_v36 = vld [vmem:[%s2990_s7 + $0x190] sm:$0xff]  ;;  %v782_v29 = vld [vmem:[%s2990_s7 + $0x20] sm:$0xff]  ;;  %v811_v2 = vld [vmem:[%s2990_s7 + $0x108] sm:$0xff] }
 0x12f   :  { %925 = vmatpush.msra.mxu0 %v824_v42  ;;  %966 = vmatpush.msra.mxu1 %v840_v8  ;;  %v798_v30 = vld [vmem:[%s2990_s7 + $0xa0] sm:$0xff]  ;;  %v827_v33 = vld [vmem:[%s2990_s7 + $0x188] sm:$0xff]  ;;  %v781_v39 = vld [vmem:[%s2990_s7 + $0x18] sm:$0xff] }
 0x130   :  { %884 = vmatpush.msrb.mxu3 %v808_v40  ;;  %844 = vmatpush.msrb.mxu2 %v791_v47  ;;  %v797_v34 = vld [vmem:[%s2990_s7 + $0x98] sm:$0xff]  ;;  %v810_v9 = vld [vmem:[%s2990_s7 + $0x100] sm:$0xff]  ;;  %v780_v38 = vld [vmem:[%s2990_s7 + $0x10] sm:$0xff] }
 0x131   :  { %926 = vmatpush.msra.mxu0 %v823_v31  ;;  %967 = vmatpush.msra.mxu1 %v839_v46  ;;  %v826_v37 = vld [vmem:[%s2990_s7 + $0x180] sm:$0xff]  ;;  %v796_v41 = vld [vmem:[%s2990_s7 + $0x90] sm:$0xff]  ;;  %v779_v42 = vld [vmem:[%s2990_s7 + $0x8] sm:$0xff] }
 0x132   :  { %885 = vmatpush.msrb.mxu3 %v807_v50  ;;  %845 = vmatpush.msrb.mxu2 %v790_v44  ;;  %v795_v8 = vld [vmem:[%s2990_s7 + $0x88] sm:$0xff]  ;;  %v778_v45 = vld [vmem:[%s2990_s7] sm:$0xff] }
 0x133   :  { %927 = vmatpush.msra.mxu0 %v822_v1  ;;  %968 = vmatpush.msra.mxu1 %v838_v24  ;;  %v794_v31 = vld [vmem:[%s2990_s7 + $0x80] sm:$0xff] }
 0x134   :  { %886 = vmatpush.msrb.mxu3 %v806_v54  ;;  %846 = vmatpush.msrb.mxu2 %v789_v57  ;;  %v736_v43 = vld [vmem:[%s2987_s4] sm:$0xf] }
 0x135   :  { %928 = vmatpush.msra.mxu0 %v821_v48  ;;  %969 = vmatpush.msra.mxu1 %v837_v51  ;;  %v740_v46 = vperm.slane %v736_v43, 2  ;;  %v741_v19 = vperm.slane %v736_v43, 3  ;;  %v738_v48 = vperm.slane %v736_v43, 0  ;;  %v739_v50 = vperm.slane %v736_v43, 1 }
 0x136   :  { %887 = vmatpush.msrb.mxu3 %v805_v14  ;;  %847 = vmatpush.msrb.mxu2 %v788_v53 }
 0x137   :  { %929 = vmatpush.msra.mxu0 %v820_v52  ;;  %970 = vmatpush.msra.mxu1 %v836_v56 }
 0x138   :  { %888 = vmatpush.msrb.mxu3 %v804_v62  ;;  %848 = vmatpush.msrb.mxu2 %v787_v4 }
 0x139   :  { %930 = vmatpush.msra.mxu0 %v819_v61  ;;  %971 = vmatpush.msra.mxu1 %v835_v63 }
 0x13a   :  { %568 = vmatmul.bf16.gmra.mxu2 %v472_v27  ;;  %889 = vmatpush.msrb.mxu3 %v803_v5 }
 0x13b   :  { %931 = vmatpush.msra.mxu0 %v818_v55  ;;  %972 = vmatpush.msra.mxu1 %v834_v3 }
 0x13c   :  { %587 = vmatmul.bf16.gmra.mxu3 %v472_v27  ;;  %711 = vmatmul.bf16.gmra.mxu0 %v615_v6 }
 0x13d   :  { %932 = vmatpush.msra.mxu0 %v817_v0  ;;  %730 = vmatmul.bf16.gmra.mxu1 %v615_v6 }
 0x13e   :  { %973 = vmatpush.msra.mxu1 %v833_v7  ;;  %849 = vmatpush.msrb.mxu2 %v786_v10 }
 0x13f   :  { %933 = vmatpush.msra.mxu0 %v816_v32  ;;  %890 = vmatpush.msrb.mxu3 %v802_v12 }
 0x140   :  { %974 = vmatpush.msra.mxu1 %v832_v11  ;;  %850 = vmatpush.msrb.mxu2 %v785_v23 }
 0x141   :  { %934 = vmatpush.msra.mxu0 %v815_v35  ;;  %891 = vmatpush.msrb.mxu3 %v801_v13 }
 0x142   :  { %975 = vmatpush.msra.mxu1 %v831_v15  ;;  %851 = vmatpush.msrb.mxu2 %v784_v18 }
 0x143   :  { %935 = vmatpush.msra.mxu0 %v814_v17  ;;  %892 = vmatpush.msrb.mxu3 %v800_v59 }
 0x144   :  { %976 = vmatpush.msra.mxu1 %v830_v60  ;;  %852 = vmatpush.msrb.mxu2 %v783_v22 }
 0x145   :  { %936 = vmatpush.msra.mxu0 %v813_v20  ;;  %893 = vmatpush.msrb.mxu3 %v799_v25 }
 0x146   :  { %977 = vmatpush.msra.mxu1 %v829_v49  ;;  %853 = vmatpush.msrb.mxu2 %v782_v29 }
 0x147   :  { %937 = vmatpush.msra.mxu0 %v812_v26  ;;  %894 = vmatpush.msrb.mxu3 %v798_v30 }
 0x148   :  { %978 = vmatpush.msra.mxu1 %v828_v36  ;;  %854 = vmatpush.msrb.mxu2 %v781_v39 }
 0x149   :  { %938 = vmatpush.msra.mxu0 %v811_v2  ;;  %895 = vmatpush.msrb.mxu3 %v797_v34 }
 0x14a   :  { %979 = vmatpush.msra.mxu1 %v827_v33  ;;  %855 = vmatpush.msrb.mxu2 %v780_v38  ;;  %v1047_v33 = vld [vmem:[%s2988_s5] sm:$0xff] }
 0x14b   :  { %939 = vmatpush.msra.mxu0 %v810_v9  ;;  %896 = vmatpush.msrb.mxu3 %v796_v41 }
 0x14c   :  { %980 = vmatpush.msra.mxu1 %v826_v37  ;;  %856 = vmatpush.msrb.mxu2 %v779_v42 }
 0x14d   :  { %897 = vmatpush.msrb.mxu3 %v795_v8 }
 0x14e   :  { %857 = vmatpush.msrb.mxu2 %v778_v45 }
 0x14f   :  { %898 = vmatpush.msrb.mxu3 %v794_v31 }
 0x150   :  { %1066 = vmatpush.msra.mxu2 %v1047_v33 }
 0x1a9   :  { %v707_v1 = vpop.f32.mrf.mxu0  ;;  %v726_v24 = vpop.f32.mrf.mxu1 }
 0x1aa   :  { %v2665_v40 = vadd.f32 %v740_v46, %v707_v1  ;;  %v2667_v47 = vadd.f32 %v741_v19, %v726_v24 }
 0x1ac   :  { %940 = vmatmul.f32.vlgmr.msra.gmra.mxu0 %v2665_v40  ;;  %981 = vmatmul.f32.vlgmr.msra.gmra.mxu1 %v2667_v47  ;;  %v764_v23 = vmul.f32 %v2665_v40, %v2665_v40  ;;  %v765_v13 = vmul.f32 %v2667_v47, %v2667_v47 }
 0x1ad   :  { %v564_v51 = vpop.f32.mrf.mxu2 }
 0x1ae   :  { %v2671_v44 = vadd.f32 %v738_v48, %v564_v51  ;;  %v583_v52 = vpop.f32.mrf.mxu3 }
 0x1af   :  { %v2673_v54 = vadd.f32 %v739_v50, %v583_v52 }
 0x1b0   :  { %858 = vmatmul.f32.vlgmr.msrb.gmra.mxu2 %v2671_v44  ;;  %v762_v15 = vmul.f32 %v2671_v44, %v2671_v44 }
 0x1b1   :  { %v709_v28 = vpop.f32.mrf.mxu0  ;;  %v728_v56 = vpop.f32.mrf.mxu1  ;;  %899 = vmatmul.f32.vlgmr.msrb.gmra.mxu3 %v2673_v54  ;;  %v763_v17 = vmul.f32 %v2673_v54, %v2673_v54 }
 0x1b2   :  { %v2676_v21 = vadd.f32 %v740_v46, %v709_v28  ;;  %v2679_v57 = vadd.f32 %v741_v19, %v728_v56 }
 0x1b4   :  { %943 = vmatmul.f32.gmra.mxu0 %v2676_v21  ;;  %984 = vmatmul.f32.gmra.mxu1 %v2679_v57  ;;  %v768_v18 = vmul.f32 %v2676_v21, %v2676_v21  ;;  %v769_v59 = vmul.f32 %v2679_v57, %v2679_v57 }
 0x1b5   :  { %v566_v16 = vpop.f32.mrf.mxu2 }
 0x1b6   :  { %v2683_v58 = vadd.f32 %v738_v48, %v566_v16  ;;  %v585_v61 = vpop.f32.mrf.mxu3 }
 0x1b7   :  { %v2685_v14 = vadd.f32 %v739_v50, %v585_v61 }
 0x1b8   :  { %861 = vmatmul.f32.gmra.mxu2 %v2683_v58  ;;  %v766_v60 = vmul.f32 %v2683_v58, %v2683_v58 }
 0x1b9   :  { %v712_v63 = vpop.f32.mrf.mxu0  ;;  %902 = vmatmul.f32.gmra.mxu3 %v2685_v14  ;;  %v767_v20 = vmul.f32 %v2685_v14, %v2685_v14 }
 0x1ba   :  { %v2688_v53 = vadd.f32 %v740_v46, %v712_v63  ;;  %v731_v55 = vpop.f32.mrf.mxu1 }
 0x1bb   :  { %v2691_v62 = vadd.f32 %v741_v19, %v731_v55 }
 0x1bc   :  { %946 = vmatmul.f32.gmra.mxu0 %v2688_v53  ;;  %v772_v22 = vmul.f32 %v2688_v53, %v2688_v53 }
 0x1bd   :  { %987 = vmatmul.f32.gmra.mxu1 %v2691_v62  ;;  %v569_v27 = vpop.f32.mrf.mxu2  ;;  %v773_v25 = vmul.f32 %v2691_v62, %v2691_v62 }
 0x1be   :  { %v2695_v3 = vadd.f32 %v738_v48, %v569_v27 }
 0x1bf   :  { %v588_v4 = vpop.f32.mrf.mxu3 }
 0x1c0   :  { %v2697_v6 = vadd.f32 %v739_v50, %v588_v4  ;;  %864 = vmatmul.f32.gmra.mxu2 %v2695_v3  ;;  %v770_v49 = vmul.f32 %v2695_v3, %v2695_v3 }
 0x1c1   :  { %v714_v0 = vpop.f32.mrf.mxu0 }
 0x1c2   :  { %v2700_v5 = vadd.f32 %v740_v46, %v714_v0  ;;  %v733_v7 = vpop.f32.mrf.mxu1  ;;  %905 = vmatmul.f32.gmra.mxu3 %v2697_v6  ;;  %v771_v26 = vmul.f32 %v2697_v6, %v2697_v6 }
 0x1c3   :  { %v2703_v32 = vadd.f32 %v741_v19, %v733_v7 }
 0x1c4   :  { %949 = vmatmul.f32.gmra.mxu0 %v2700_v5  ;;  %v776_v36 = vmul.f32 %v2700_v5, %v2700_v5 }
 0x1c5   :  { %990 = vmatmul.f32.gmra.mxu1 %v2703_v32  ;;  %v571_v10 = vpop.f32.mrf.mxu2  ;;  %v777_v29 = vmul.f32 %v2703_v32, %v2703_v32 }
 0x1c6   :  { %v2707_v12 = vadd.f32 %v738_v48, %v571_v10 }
 0x1c7   :  { %v590_v11 = vpop.f32.mrf.mxu3 }
 0x1c8   :  { %v2709_v35 = vadd.f32 %v739_v50, %v590_v11  ;;  %867 = vmatmul.f32.gmra.mxu2 %v2707_v12  ;;  %v774_v30 = vmul.f32 %v2707_v12, %v2707_v12 }
 0x1ca   :  { %908 = vmatmul.f32.gmra.mxu3 %v2709_v35  ;;  %v775_v2 = vmul.f32 %v2709_v35, %v2709_v35 }
 0x1cc   :  { %952 = vmatmul.f32.gmra.mxu0 %v764_v23 }
 0x1cd   :  { %993 = vmatmul.f32.gmra.mxu1 %v765_v13 }
 0x1d0   :  { %870 = vmatmul.f32.gmra.mxu2 %v762_v15 }
 0x1d2   :  { %911 = vmatmul.f32.gmra.mxu3 %v763_v17 }
 0x1d4   :  { %955 = vmatmul.f32.gmra.mxu0 %v768_v18 }
 0x1d5   :  { %996 = vmatmul.f32.gmra.mxu1 %v769_v59 }
 0x1d8   :  { %873 = vmatmul.f32.gmra.mxu2 %v766_v60 }
 0x1da   :  { %914 = vmatmul.f32.gmra.mxu3 %v767_v20 }
 0x1dc   :  { %958 = vmatmul.f32.gmra.mxu0 %v772_v22 }
 0x1dd   :  { %999 = vmatmul.f32.gmra.mxu1 %v773_v25 }
 0x1e0   :  { %876 = vmatmul.f32.gmra.mxu2 %v770_v49 }
 0x1e2   :  { %917 = vmatmul.f32.gmra.mxu3 %v771_v26 }
 0x1e4   :  { %961 = vmatmul.f32.gmra.mxu0 %v776_v36 }
 0x1e5   :  { %1002 = vmatmul.f32.gmra.mxu1 %v777_v29 }
 0x1e8   :  { %879 = vmatmul.f32.gmra.mxu2 %v774_v30 }
 0x1ea   :  { %920 = vmatmul.f32.gmra.mxu3 %v775_v2 }
 0x229   :  { %v941_v39 = vpop.f32.mrf.mxu0  ;;  %v982_v34 = vpop.f32.mrf.mxu1 }
 0x231   :  { %v944_v9 = vpop.f32.mrf.mxu0  ;;  %v985_v38 = vpop.f32.mrf.mxu1 }
 0x233   :  { %v859_v37 = vpop.f32.mrf.mxu2 }
 0x234   :  { %v900_v41 = vpop.f32.mrf.mxu3 }
 0x235   :  { %v901_v42 = vadd.f32 %v900_v41, %v859_v37 }
 0x237   :  { %v942_v19 = vadd.f32 %v941_v39, %v901_v42 }
 0x239   :  { %v947_v45 = vpop.f32.mrf.mxu0  ;;  %v983_v48 = vadd.f32 %v982_v34, %v942_v19 }
 0x23a   :  { %v988_v46 = vpop.f32.mrf.mxu1 }
 0x23b   :  { %v862_v8 = vpop.f32.mrf.mxu2  ;;  %v1007_v56 = vsel %vm1006_vm9, %v983_v48, 0.0 }
 0x23c   :  { %v903_v31 = vpop.f32.mrf.mxu3 }
 0x23d   :  { %v904_v43 = vadd.f32 %v903_v31, %v862_v8 }
 0x23f   :  { %v945_v1 = vadd.f32 %v944_v9, %v904_v43 }
 0x241   :  { %v986_v24 = vadd.f32 %v985_v38, %v945_v1  ;;  %v950_v28 = vpop.f32.mrf.mxu0  ;;  %v1072_v1 = vld [vmem:[%s2989_s6] sm:$0xff] }
 0x242   :  { %v991_v63 = vpop.f32.mrf.mxu1  ;;  %1091 = vmatpush.msra.mxu3 %v1072_v1 }
 0x243   :  { %v865_v50 = vpop.f32.mrf.mxu2  ;;  %v1008_v52 = vsel %vm1006_vm9, %v986_v24, 0.0 }
 0x244   :  { %v1009_v61 = vadd.f32 %v1008_v52, %v1007_v56 }
 0x245   :  { %v906_v51 = vpop.f32.mrf.mxu3 }
 0x246   :  { %v907_v16 = vadd.f32 %v906_v51, %v865_v50  ;;  %v1010_v4 = vrot.slane %v1009_v61, 4 }
 0x248   :  { %v948_v55 = vadd.f32 %v947_v45, %v907_v16  ;;  %v1011_v23 = vadd.f32 %v1010_v4, %v1009_v61 }
 0x249   :  { %v953_v13 = vpop.f32.mrf.mxu0 }
 0x24a   :  { %v989_v10 = vadd.f32 %v988_v46, %v948_v55  ;;  %v994_v17 = vpop.f32.mrf.mxu1  ;;  %v1012_v20 = vrot.slane %v1011_v23, 2 }
 0x24b   :  { %v868_v27 = vpop.f32.mrf.mxu2 }
 0x24c   :  { %v1016_v18 = vsel %vm1006_vm9, %v989_v10, 0.0  ;;  %v1013_v36 = vadd.f32 %v1012_v20, %v1011_v23 }
 0x24d   :  { %v909_v0 = vpop.f32.mrf.mxu3 }
 0x24e   :  { %v910_v7 = vadd.f32 %v909_v0, %v868_v27  ;;  %v1014_v34 = vrot.slane %v1013_v36, 1 }
 0x250   :  { %v951_v11 = vadd.f32 %v950_v28, %v910_v7  ;;  %v1015_v31 = vadd.f32 %v1014_v34, %v1013_v36 }
 0x251   :  { %v956_v2 = vpop.f32.mrf.mxu0 }
 0x252   :  { %v992_v15 = vadd.f32 %v991_v63, %v951_v11  ;;  %v997_v37 = vpop.f32.mrf.mxu1 }
 0x253   :  { %v871_v60 = vpop.f32.mrf.mxu2 }
 0x254   :  { %v1017_v59 = vsel %vm1006_vm9, %v992_v15, 0.0 }
 0x255   :  { %v1018_v22 = vadd.f32 %v1017_v59, %v1016_v18  ;;  %v912_v25 = vpop.f32.mrf.mxu3 }
 0x256   :  { %v913_v26 = vadd.f32 %v912_v25, %v871_v60 }
 0x257   :  { %v1019_v49 = vrot.slane %v1018_v22, 4 }
 0x258   :  { %v954_v33 = vadd.f32 %v953_v13, %v913_v26 }
 0x259   :  { %v1020_v29 = vadd.f32 %v1019_v49, %v1018_v22  ;;  %v959_v52 = vpop.f32.mrf.mxu0 }
 0x25a   :  { %v995_v8 = vadd.f32 %v994_v17, %v954_v33  ;;  %v1000_v16 = vpop.f32.mrf.mxu1 }
 0x25b   :  { %v1021_v30 = vrot.slane %v1020_v29, 2  ;;  %v874_v39 = vpop.f32.mrf.mxu2 }
 0x25c   :  { %v1027_v24 = vsel %vm1006_vm9, %v995_v8, 0.0 }
 0x25d   :  { %v1022_v9 = vadd.f32 %v1021_v30, %v1020_v29  ;;  %v915_v38 = vpop.f32.mrf.mxu3 }
 0x25e   :  { %v916_v41 = vadd.f32 %v915_v38, %v874_v39 }
 0x25f   :  { %v1023_v42 = vrot.slane %v1022_v9, 1 }
 0x260   :  { %v957_v45 = vadd.f32 %v956_v2, %v916_v41 }
 0x261   :  { %v1024_v43 = vadd.f32 %v1023_v42, %v1022_v9  ;;  %v962_v7 = vpop.f32.mrf.mxu0 }
 0x262   :  { %v998_v46 = vadd.f32 %v997_v37, %v957_v45  ;;  %v1003_v13 = vpop.f32.mrf.mxu1 }
 0x263   :  { %v1026_v19 = vsel %vm1025_vm10, %v1015_v31, %v1024_v43  ;;  %v877_v50 = vpop.f32.mrf.mxu2 }
 0x264   :  { %v1028_v48 = vsel %vm1006_vm9, %v998_v46, 0.0  ;;  %v1046_v51 = vmul.f32 0.0009765625, %v1026_v19 }
 0x265   :  { %v1029_v28 = vadd.f32 %v1028_v48, %v1027_v24  ;;  %v918_v56 = vpop.f32.mrf.mxu3 }
 0x266   :  { %1899 = vmatmul.msk.f32.vlgmr.msra.gmra.mxu2 %vm1006_vm9, %v1046_v51  ;;  %v919_v61 = vadd.f32 %v918_v56, %v877_v50 }
 0x267   :  { %v1030_v27 = vrot.slane %v1029_v28, 4 }
 0x268   :  { %v960_v63 = vadd.f32 %v959_v52, %v919_v61 }
 0x269   :  { %v1031_v23 = vadd.f32 %v1030_v27, %v1029_v28  ;;  %v1144_v27 = vld [vmem:[%s2991_s8 + $0x10] sm:$0xff] }
 0x26a   :  { %v1001_v10 = vadd.f32 %v1000_v16, %v960_v63  ;;  %1988 = vmatpush.msrb.mxu1 %v1144_v27  ;;  %1232 = vmatpush.msrb.mxu0 %v1144_v27 }
 0x26b   :  { %v880_v55 = vpop.f32.mrf.mxu2  ;;  %v1032_v59 = vrot.slane %v1031_v23, 2 }
 0x26c   :  { %v1036_v17 = vsel %vm1006_vm9, %v1001_v10, 0.0 }
 0x26d   :  { %v921_v4 = vpop.f32.mrf.mxu3  ;;  %v1033_v22 = vadd.f32 %v1032_v59, %v1031_v23 }
 0x26e   :  { %v922_v0 = vadd.f32 %v921_v4, %v880_v55  ;;  %v1143_v4 = vld [vmem:[%s2991_s8 + $0x8] sm:$0xff] }
 0x26f   :  { %v1034_v26 = vrot.slane %v1033_v22, 1  ;;  %1200 = vmatpush.msrb.mxu3 %v1143_v4 }
 0x270   :  { %v963_v11 = vadd.f32 %v962_v7, %v922_v0 }
 0x271   :  { %v1035_v30 = vadd.f32 %v1034_v26, %v1033_v22 }
 0x272   :  { %v1004_v15 = vadd.f32 %v1003_v13, %v963_v11 }
 0x274   :  { %v1037_v18 = vsel %vm1006_vm9, %v1004_v15, 0.0 }
 0x275   :  { %v1038_v60 = vadd.f32 %v1037_v18, %v1036_v17  ;;  %v1145_v17 = vld [vmem:[%s2991_s8 + $0x18] sm:$0xff] }
 0x276   :  { %1264 = vmatpush.msra.mxu1 %v1145_v17 }
 0x277   :  { %v1039_v20 = vrot.slane %v1038_v60, 4 }
 0x279   :  { %v1040_v25 = vadd.f32 %v1039_v20, %v1038_v60 }
 0x27b   :  { %v1041_v49 = vrot.slane %v1040_v25, 2 }
 0x27d   :  { %v1042_v36 = vadd.f32 %v1041_v49, %v1040_v25 }
 0x27f   :  { %v1043_v29 = vrot.slane %v1042_v36, 1 }
 0x281   :  { %v1044_v2 = vadd.f32 %v1043_v29, %v1042_v36 }
 0x283   :  { %v1045_v33 = vsel %vm1025_vm10, %v1035_v30, %v1044_v2  ;;  %vm1708_vm10 = vcmask 130048  }
 0x2e9   :  { %v1068_v39 = vpop.f32.mrf.mxu2 }
 0x2ea   :  { %v1071_v34 = vmax.f32 %v1068_v39, 0.0 }
 0x2ec   :  { %1900 = vmatmul.msk.f32.vlgmr.msra.gmra.mxu3 %vm1006_vm9, %v1071_v34 }
 0x36f   :  { %v1093_v9 = vpop.f32.mrf.mxu3 }
 0x370   :  { %v1096_v37 = vsub.f32 0.0, %v1093_v9 }
 0x372   :  { %v1097_v38 = vmul.f32 1.442695, %v1096_v37 }
 0x374   :  { %2066 = vpow2.f32 %v1097_v38 }
 0x37a   :  { %v2067_v41 = vpop.eup %2066 }
 0x37b   :  { %v1099_v42 = vadd.f32 1.0, %v2067_v41 }
 0x37d   :  { %2068 = vrcp.f32 %v1099_v42 }
 0x383   :  { %v2069_v8 = vpop.eup %2068 }
 0x384   :  { %v1101_v45 = vmul.f32 %v2069_v8, %v1026_v19  ;;  %v1111_v31 = vmul.f32 %v2069_v8, %v2069_v8  ;;  %v1142_v19 = vld [vmem:[%s2991_s8] sm:$0xff]  ;;  %s2094_s8 = smov 64  }
 0x385   :  { %1168 = vmatpush.msrb.mxu2 %v1142_v19 }
 0x386   :  { %v1103_v43 = vsel %vm1102_vm11, %v1101_v45, 0.0  ;;  %v1112_v46 = vmul.f32 %v1111_v31, %v1045_v33 }
 0x387   :  { %v1104_v1 = vrot.slane %v1103_v43, 4 }
 0x388   :  { %v1113_v24 = vsel %vm1102_vm11, %v1112_v46, 0.0 }
 0x389   :  { %v1105_v48 = vadd.f32 %v1104_v1, %v1103_v43  ;;  %v1114_v50 = vrot.slane %v1113_v24, 4 }
 0x38b   :  { %v1106_v51 = vrot.slane %v1105_v48, 2  ;;  %v1115_v52 = vadd.f32 %v1114_v50, %v1113_v24 }
 0x38d   :  { %v1107_v28 = vadd.f32 %v1106_v51, %v1105_v48  ;;  %v1116_v56 = vrot.slane %v1115_v52, 2 }
 0x38f   :  { %v1108_v16 = vrot.slane %v1107_v28, 1  ;;  %v1117_v61 = vadd.f32 %v1116_v56, %v1115_v52 }
 0x391   :  { %v1109_v63 = vadd.f32 %v1108_v16, %v1107_v28  ;;  %v1118_v55 = vrot.slane %v1117_v61, 1 }
 0x393   :  { %v1110_v0 = vmul.f32 0.00048828125, %v1109_v63  ;;  %v1119_v7 = vadd.f32 %v1118_v55, %v1117_v61 }
 0x395   :  { %v1120_v10 = vmul.f32 0.00048828125, %v1119_v7  ;;  %v1121_v11 = vmul.f32 %v1110_v0, %v1110_v0 }
 0x397   :  { %v1122_v23 = vsub.f32 %v1120_v10, %v1121_v11 }
 0x399   :  { %v1123_v13 = vmax.f32 %v1122_v23, 0.0 }
 0x39b   :  { %v1124_v15 = vadd.f32 1e-05, %v1123_v13 }
 0x39d   :  { %2070 = vrsqrt.f32 %v1124_v15  ;;  %vm1131_vm13 = vweird.f32 %v1124_v15 }
 0x3a3   :  { %v2071_v18 = vpop.eup %2070 }
 0x3a4   :  { %v1126_v59 = vmul.f32 %v2071_v18, %v1124_v15  ;;  %vm1132_vm12 = vweird.f32 %v2071_v18 }
 0x3a5   :  { %vm1133_vm14 = vmor %vm1131_vm13, %vm1132_vm12 }
 0x3a6   :  { %v1127_v60 = vmul.f32 %v2071_v18, %v1126_v59 }
 0x3a8   :  { %v1128_v20 = vmul.f32 0.5, %v1127_v60 }
 0x3aa   :  { %v1129_v22 = vsub.f32 1.5, %v1128_v20 }
 0x3ac   :  { %v1130_v25 = vmul.f32 %v2071_v18, %v1129_v22 }
 0x3ae   :  { %v1134_v49 = vsel %vm1133_vm14, %v2071_v18, %v1130_v25 }
 0x3af   :  { %v1135_v26 = vmul.f32 %v2069_v8, %v1134_v49  ;;  %v1138_v30 = vmul.f32 %v1134_v49, %v1110_v0 }
 0x3b1   :  { %v1136_v36 = vperm.slane %v1135_v26, 0  ;;  %v1137_v29 = vperm.slane %v1135_v26, 1  ;;  %v1139_v2 = vsub.f32 0.0, %v1138_v30 }
 0x3b3   :  { %1901 = vmatmul.msk.f32.vlgmr.msrb.gmra.mxu2 %vm1006_vm9, %v1136_v36  ;;  %1906 = vmatmul.msk.f32.vlgmr.msrb.gmra.mxu3 %vm1006_vm9, %v1136_v36 }
 0x3b4   :  { %1911 = vmatmul.msk.f32.vlgmr.msrb.gmra.mxu0 %vm1006_vm9, %v1136_v36  ;;  %1913 = vmatmul.msk.f32.vlgmr.msrb.gmra.mxu1 %vm1006_vm9, %v1137_v29 }
 0x3bb   :  { %1902 = vmatmul.msk.f32.gmra.mxu2 %vm1006_vm9, %v1136_v36  ;;  %1907 = vmatmul.msk.f32.gmra.mxu3 %vm1006_vm9, %v1136_v36 }
 0x3bc   :  { %1912 = vmatmul.msk.f32.gmra.mxu0 %vm1006_vm9, %v1136_v36  ;;  %1914 = vmatmul.msk.f32.gmra.mxu1 %vm1006_vm9, %v1137_v29 }
 0x3c3   :  { %1903 = vmatmul.msk.f32.gmra.mxu2 %vm1006_vm9, %v1137_v29  ;;  %1908 = vmatmul.msk.f32.gmra.mxu3 %vm1006_vm9, %v1137_v29 }
 0x3c4   :  { %1915 = vmatmul.msk.f32.gmra.mxu1 %vm1006_vm9, %v1139_v2 }
 0x3cb   :  { %1904 = vmatmul.msk.f32.gmra.mxu2 %vm1006_vm9, %v1137_v29  ;;  %1909 = vmatmul.msk.f32.gmra.mxu3 %vm1006_vm9, %v1137_v29 }
 0x3cc   :  { %1916 = vmatmul.msk.f32.vlgmr.msra.gmra.mxu1 %vm1006_vm9, %v1136_v36 }
 0x3d3   :  { %1905 = vmatmul.msk.f32.gmra.mxu2 %vm1006_vm9, %v1139_v2  ;;  %1910 = vmatmul.msk.f32.gmra.mxu3 %vm1006_vm9, %v1139_v2 }
 0x3d4   :  { %1917 = vmatmul.msk.f32.gmra.mxu1 %vm1006_vm9, %v1136_v36 }
 0x3dc   :  { %1918 = vmatmul.msk.f32.gmra.mxu1 %vm1006_vm9, %v1137_v29 }
 0x3e4   :  { %1919 = vmatmul.msk.f32.gmra.mxu1 %vm1006_vm9, %v1137_v29 }
 0x3ec   :  { %1920 = vmatmul.msk.f32.gmra.mxu1 %vm1006_vm9, %v1139_v2 }
 0x431   :  { %v1240_v33 = vpop.f32.mrf.mxu1  ;;  %v1234_v39 = vpop.f32.mrf.mxu0 }
 0x432   :  { %v1283_v8 = vmul.f32 %v1234_v39, %v2665_v40  ;;  %v1291_v31 = vmul.f32 %v1240_v33, %v2688_v53 }
 0x436   :  { %v1170_v34 = vpop.f32.mrf.mxu2  ;;  %v1202_v9 = vpop.f32.mrf.mxu3 }
 0x437   :  { %v1282_v61 = vmul.f32 %v1202_v9, %v2673_v54  ;;  %v1281_v10 = vmul.f32 %v1170_v34, %v2671_v44 }
 0x439   :  { %v1243_v37 = vpop.f32.mrf.mxu1  ;;  %v1237_v42 = vpop.f32.mrf.mxu0 }
 0x43a   :  { %v1287_v43 = vmul.f32 %v1237_v42, %v2676_v21  ;;  %v1295_v46 = vmul.f32 %v1243_v37, %v2700_v5 }
 0x43e   :  { %v1173_v38 = vpop.f32.mrf.mxu2  ;;  %v1205_v41 = vpop.f32.mrf.mxu3 }
 0x43f   :  { %v1286_v63 = vmul.f32 %v1205_v41, %v2685_v14  ;;  %v1285_v11 = vmul.f32 %v1173_v38, %v2683_v58 }
 0x441   :  { %v1246_v45 = vpop.f32.mrf.mxu1 }
 0x442   :  { %v1299_v1 = vperm.slane %v1246_v45, 0 }
 0x444   :  { %v2799_v24 = vadd.f32 %v1299_v1, %v1291_v31  ;;  %v2801_v48 = vadd.f32 %v1299_v1, %v1295_v46  ;;  %v2803_v50 = vadd.f32 %v1299_v1, %v1283_v8  ;;  %v2805_v51 = vadd.f32 %v1299_v1, %v1287_v43 }
 0x446   :  { %v1176_v52 = vpop.f32.mrf.mxu2  ;;  %v1208_v28 = vpop.f32.mrf.mxu3  ;;  %v1390_v40 = vpack.c.bf16 %v2801_v48, %v2799_v24  ;;  %v1389_v53 = vpack.c.bf16 %v2805_v51, %v2803_v50  ;;  %v2048_v26 = vpack.i.bf16 %v2801_v48, %v2799_v24  ;;  %v1987_v24 = vld [vmem:[%s2992_s9 + $0x14] sm:$0xf0] }
 0x447   :  { %v1290_v19 = vmul.f32 %v1208_v28, %v2697_v6  ;;  %v1289_v23 = vmul.f32 %v1176_v52, %v2695_v3 }
 0x449   :  { %v1266_v21 = vpop.f32.mrf.mxu1 }
 0x44a   :  { %v1284_v36 = vmul.f32 %v1266_v21, %v2667_v47  ;;  %v2058_v47 = vpack.i.bf16 %v2805_v51, %v2803_v50  ;;  %v1933_v50 = vld [vmem:[%s2992_s9 + $0x18] sm:$0xf0] }
 0x44e   :  { %v1179_v56 = vpop.f32.mrf.mxu2  ;;  %v1211_v5 = vpop.f32.mrf.mxu3 }
 0x44f   :  { %v1294_v4 = vmul.f32 %v1211_v5, %v2709_v35  ;;  %v1293_v13 = vmul.f32 %v1179_v56, %v2707_v12 }
 0x451   :  { %v1269_v16 = vpop.f32.mrf.mxu1 }
 0x452   :  { %v1288_v30 = vmul.f32 %v1269_v16, %v2679_v57 }
 0x456   :  { %v1182_v55 = vpop.f32.mrf.mxu2  ;;  %v1214_v27 = vpop.f32.mrf.mxu3 }
 0x457   :  { %v1297_v0 = vperm.slane %v1182_v55, 0  ;;  %v1298_v7 = vperm.slane %v1214_v27, 0 }
 0x459   :  { %v1272_v15 = vpop.f32.mrf.mxu1  ;;  %v1310_v54 = vadd.f32 %v1298_v7, %v1290_v19  ;;  %v1314_v17 = vadd.f32 %v1298_v7, %v1294_v4  ;;  %v1302_v14 = vadd.f32 %v1298_v7, %v1282_v61  ;;  %v1306_v18 = vadd.f32 %v1298_v7, %v1286_v63 }
 0x45a   :  { %v2819_v59 = vadd.f32 %v1297_v0, %v1289_v23  ;;  %v2821_v6 = vadd.f32 %v1297_v0, %v1293_v13  ;;  %v2823_v35 = vadd.f32 %v1297_v0, %v1281_v10  ;;  %v2825_v44 = vadd.f32 %v1297_v0, %v1285_v11 }
 0x45b   :  { %v2023_v60 = vpack.i.bf16 %v1314_v17, %v1310_v54  ;;  %v2033_v20 = vpack.i.bf16 %v1306_v18, %v1302_v14  ;;  %v1386_v58 = vpack.c.bf16 %v1314_v17, %v1310_v54  ;;  %v1385_v12 = vpack.c.bf16 %v1306_v18, %v1302_v14  ;;  %v1923_v18 = vld [vmem:[%s2992_s9] sm:$0xf] }
 0x45c   :  { %v2043_v3 = vpack.i.bf16 %v2821_v6, %v2819_v59  ;;  %v1382_v22 = vpack.c.bf16 %v2821_v6, %v2819_v59  ;;  %v1381_v25 = vpack.c.bf16 %v2825_v44, %v2823_v35  ;;  %v1292_v2 = vmul.f32 %v1272_v15, %v2691_v62  ;;  %v1984_v6 = vld [vmem:[%s2992_s9 + $0x4] sm:$0xf] }
 0x45d   :  { %2024 = vrot.lane.b32.xlu0 %v2023_v60, %s2094_s8  ;;  %2034 = vrot.lane.b32.xlu1 %v2033_v20, %s2094_s8  ;;  %v2053_v57 = vpack.i.bf16 %v2825_v44, %v2823_v35  ;;  %v1985_v60 = vld [vmem:[%s2992_s9 + $0x4] sm:$0xf0]  ;;  %v1931_v35 = vld [vmem:[%s2992_s9 + $0x10] sm:$0xf] }
 0x45e   :  { %2044 = vrot.lane.b32.xlu2 %v2043_v3, %s2094_s8  ;;  %v1932_v48 = vor.u32 %v1987_v24, %v1931_v35 }
 0x461   :  { %v1275_v49 = vpop.f32.mrf.mxu1 }
 0x462   :  { %v1296_v33 = vmul.f32 %v1275_v49, %v2703_v32 }
 0x466   :  { %2049 = vrot.lane.b32.xlu2 %v2048_v26, %s2094_s8 }
 0x469   :  { %v1278_v29 = vpop.f32.mrf.mxu1 }
 0x46a   :  { %v1300_v39 = vperm.slane %v1278_v29, 0 }
 0x46c   :  { %v1312_v34 = vadd.f32 %v1300_v39, %v1292_v2  ;;  %v1316_v9 = vadd.f32 %v1300_v39, %v1296_v33  ;;  %v1304_v37 = vadd.f32 %v1300_v39, %v1284_v36  ;;  %v1308_v38 = vadd.f32 %v1300_v39, %v1288_v30 }
 0x46e   :  { %v2028_v41 = vpack.i.bf16 %v1316_v9, %v1312_v34  ;;  %v2038_v42 = vpack.i.bf16 %v1308_v38, %v1304_v37  ;;  %v1394_v8 = vpack.c.bf16 %v1316_v9, %v1312_v34  ;;  %v1393_v45 = vpack.c.bf16 %v1308_v38, %v1304_v37 }
 0x470   :  { %2029 = vrot.lane.b32.xlu0 %v2028_v41, %s2094_s8  ;;  %2039 = vrot.lane.b32.xlu1 %v2038_v42, %s2094_s8 }
 0x478   :  { %2059 = vrot.lane.b32.xlu1 %v2058_v47, %s2094_s8  ;;  %2054 = vrot.lane.b32.xlu0 %v2053_v57, %s2094_s8 }
 0x4b8   :  { %v2045_v21 = vpop.permute.xlu2 %2044 }
 0x4b9   :  { %v2047_v56 = vunpack.i.h.bf16 %v2045_v21  ;;  %v2046_v5 = vunpack.i.l.bf16 %v2045_v21 }
 0x4bb   :  { %v1384_v16 = vpack.c.bf16 %v2047_v56, %v2046_v5 }
 0x4c0   :  { %v2050_v15 = vpop.permute.xlu2 %2049 }
 0x4c1   :  { %v2052_v54 = vunpack.i.h.bf16 %v2050_v15  ;;  %v2051_v17 = vunpack.i.l.bf16 %v2050_v15 }
 0x4c3   :  { %v1392_v20 = vpack.c.bf16 %v2052_v54, %v2051_v17 }
 0x4cf   :  { %v2025_v62 = vpop.permute.xlu0 %2024  ;;  %v2035_v32 = vpop.permute.xlu1 %2034 }
 0x4d0   :  { %v2027_v31 = vunpack.i.h.bf16 %v2025_v62  ;;  %v2026_v43 = vunpack.i.l.bf16 %v2025_v62  ;;  %v2037_v1 = vunpack.i.h.bf16 %v2035_v32  ;;  %v2036_v52 = vunpack.i.l.bf16 %v2035_v32 }
 0x4d2   :  { %v1388_v46 = vpack.c.bf16 %v2027_v31, %v2026_v43  ;;  %v1387_v28 = vpack.c.bf16 %v2037_v1, %v2036_v52 }
 0x4d4   :  { %1421 = vmatpush.bf16.msra.mxu2 %v1388_v46  ;;  %v2095_v46 = vmov 0  }
 0x4d5   :  { %2063 = vset.pattern.permute.xlu0 %v2095_v46  ;;  %2065 = vset.pattern.permute.xlu2 %v2095_v46 }
 0x4d6   :  { %2064 = vset.pattern.permute.xlu1 %v2095_v46 }
 0x4d8   :  { %1422 = vmatpush.bf16.msra.mxu2 %v1387_v28 }
 0x4dc   :  { %1423 = vmatpush.bf16.msra.mxu2 %v1386_v58 }
 0x4e0   :  { %1424 = vmatpush.bf16.msra.mxu2 %v1385_v12  ;;  %v1924_v12 = vor.u32 %v1985_v60, %v1923_v18 }
 0x4e2   :  { %v2030_v61 = vpop.permute.xlu0 %2029  ;;  %v2040_v63 = vpop.permute.xlu1 %2039 }
 0x4e3   :  { %v2032_v55 = vunpack.i.h.bf16 %v2030_v61  ;;  %v2031_v27 = vunpack.i.l.bf16 %v2030_v61  ;;  %v2042_v4 = vunpack.i.h.bf16 %v2040_v63  ;;  %v2041_v0 = vunpack.i.l.bf16 %v2040_v63 }
 0x4e4   :  { %1425 = vmatpush.bf16.msra.mxu2 %v1384_v16 }
 0x4e5   :  { %v1396_v19 = vpack.c.bf16 %v2032_v55, %v2031_v27  ;;  %v1395_v7 = vpack.c.bf16 %v2042_v4, %v2041_v0 }
 0x4e7   :  { %1440 = vmatpush.bf16.msra.mxu3 %v1396_v19 }
 0x4ea   :  { %v2055_v10 = vpop.permute.xlu0 %2054  ;;  %v2060_v14 = vpop.permute.xlu1 %2059 }
 0x4eb   :  { %v2057_v11 = vunpack.i.h.bf16 %v2055_v10  ;;  %v2056_v23 = vunpack.i.l.bf16 %v2055_v10  ;;  %1441 = vmatpush.bf16.msra.mxu3 %v1395_v7  ;;  %v2062_v58 = vunpack.i.h.bf16 %v2060_v14  ;;  %v2061_v3 = vunpack.i.l.bf16 %v2060_v14 }
 0x4ed   :  { %v1383_v13 = vpack.c.bf16 %v2057_v11, %v2056_v23  ;;  %v1391_v59 = vpack.c.bf16 %v2062_v58, %v2061_v3 }
 0x4ef   :  { %1426 = vmatpush.bf16.msra.mxu2 %v1383_v13  ;;  %1442 = vmatpush.bf16.msra.mxu3 %v1394_v8 }
 0x4f3   :  { %1427 = vmatpush.bf16.msra.mxu2 %v1382_v22  ;;  %1443 = vmatpush.bf16.msra.mxu3 %v1393_v45  ;;  %v1925_v22 = vld [vmem:[%s2992_s9 + $0x8] sm:$0xf0] }
 0x4f4   :  { %v1928_v49 = vor.u32 %v1984_v6, %v1925_v22 }
 0x4f7   :  { %1428 = vmatpush.bf16.msra.mxu2 %v1381_v25  ;;  %1444 = vmatpush.bf16.msra.mxu3 %v1392_v20 }
 0x4fa   :  { %1429 = vmatmul.bf16.vlgmr.msra.gmra.mxu2 %v1924_v12 }
 0x4fb   :  { %1445 = vmatpush.bf16.msra.mxu3 %v1391_v59 }
 0x4ff   :  { %1446 = vmatpush.bf16.msra.mxu3 %v1390_v40  ;;  %v1986_v40 = vld [vmem:[%s2992_s9 + $0x14] sm:$0xf] }
 0x500   :  { %v1936_v51 = vor.u32 %v1986_v40, %v1933_v50 }
 0x503   :  { %1447 = vmatpush.bf16.msra.mxu3 %v1389_v53 }
 0x506   :  { %1448 = vmatmul.bf16.vlgmr.msra.gmra.mxu3 %v1928_v49 }
 0x50a   :  { %1434 = vmatmul.bf16.gmra.mxu2 %v1932_v48 }
 0x516   :  { %1453 = vmatmul.bf16.gmra.mxu3 %v1936_v51 }
 0x57d   :  { %v1430_v53 = vpop.f32.mrf.mxu2 }
 0x585   :  { %v1432_v29 = vpop.f32.mrf.mxu2 }
 0x589   :  { %v1449_v44 = vpop.f32.mrf.mxu3 }
 0x58a   :  { %v2879_v25 = vadd.f32 %v1449_v44, %v1430_v53 }
 0x58c   :  { %v1459_v26 = vsel %vm185_vm0, %v2879_v25, 0.0  ;;  %v1467_v36 = vmul.f32 %v2879_v25, %v2879_v25 }
 0x58d   :  { %1460 = vadd.xlane.f32.xlu2 %v1459_v26  ;;  %v1435_v37 = vpop.f32.mrf.mxu2 }
 0x58e   :  { %v1469_v30 = vsel %vm185_vm0, %v1467_v36, 0.0  ;;  %v1666_v36 = vld [vmem:[%s2993_s10 + $0x38] sm:$0xff] }
 0x58f   :  { %1470 = vadd.xlane.f32.xlu1 %v1469_v30  ;;  %1687 = vmatpush.msra.mxu0 %v1666_v36 }
 0x591   :  { %v1451_v2 = vpop.f32.mrf.mxu3 }
 0x592   :  { %v2886_v33 = vadd.f32 %v1451_v2, %v1432_v29 }
 0x594   :  { %v1462_v39 = vsel %vm185_vm0, %v2886_v33, 0.0  ;;  %v1468_v34 = vmul.f32 %v2886_v33, %v2886_v33 }
 0x595   :  { %1463 = vadd.xlane.f32.xlu2 %v1462_v39  ;;  %v1437_v47 = vpop.f32.mrf.mxu2 }
 0x596   :  { %v1472_v9 = vsel %vm185_vm0, %v1468_v34, 0.0 }
 0x597   :  { %1473 = vadd.xlane.f32.xlu1 %v1472_v9  ;;  %v1664_v9 = vld [vmem:[%s2993_s10 + $0x28] sm:$0xff] }
 0x599   :  { %v1454_v38 = vpop.f32.mrf.mxu3 }
 0x59a   :  { %v2893_v41 = vadd.f32 %v1454_v38, %v1435_v37 }
 0x59c   :  { %v1477_v42 = vsel %vm185_vm0, %v2893_v41, 0.0  ;;  %v1485_v8 = vmul.f32 %v2893_v41, %v2893_v41 }
 0x59d   :  { %1478 = vadd.xlane.f32.xlu0 %v1477_v42 }
 0x59e   :  { %v1487_v45 = vsel %vm185_vm0, %v1485_v8, 0.0 }
 0x59f   :  { %1488 = vadd.xlane.f32.xlu2 %v1487_v45  ;;  %v1663_v45 = vld [vmem:[%s2993_s10 + $0x20] sm:$0xff] }
 0x5a1   :  { %v1456_v57 = vpop.f32.mrf.mxu3 }
 0x5a2   :  { %v2900_v62 = vadd.f32 %v1456_v57, %v1437_v47 }
 0x5a4   :  { %v1480_v32 = vsel %vm185_vm0, %v2900_v62, 0.0  ;;  %v1486_v31 = vmul.f32 %v2900_v62, %v2900_v62 }
 0x5a5   :  { %1481 = vadd.xlane.f32.xlu0 %v1480_v32  ;;  %v1662_v32 = vld [vmem:[%s2993_s10 + $0x18] sm:$0xff] }
 0x5a6   :  { %v1490_v43 = vsel %vm185_vm0, %v1486_v31, 0.0 }
 0x5a7   :  { %1491 = vadd.xlane.f32.xlu2 %v1490_v43 }
 0x600   :  { %v1461_v1 = vpop.xlane.xlu2 %1460 }
 0x602   :  { %v1471_v28 = vpop.xlane.xlu1 %1470 }
 0x608   :  { %v1464_v52 = vpop.xlane.xlu2 %1463 }
 0x60a   :  { %v1474_v7 = vpop.xlane.xlu1 %1473 }
 0x610   :  { %v1479_v21 = vpop.xlane.xlu0 %1478 }
 0x611   :  { %v1483_v56 = vadd.f32 %v1479_v21, %v1461_v1  ;;  %v1660_v1 = vld [vmem:[%s2993_s10 + $0x8] sm:$0xff] }
 0x612   :  { %v1489_v5 = vpop.xlane.xlu2 %1488 }
 0x613   :  { %v1495_v16 = vmul.f32 0.0078125, %v1483_v56  ;;  %v1493_v61 = vadd.f32 %v1489_v5, %v1471_v28  ;;  %v1659_v28 = vld [vmem:[%s2993_s10] sm:$0xff] }
 0x615   :  { %v1499_v63 = vmul.f32 %v1495_v16, %v1495_v16  ;;  %v1497_v55 = vmul.f32 0.0078125, %v1493_v61  ;;  %1529 = vperm.xlu0 %2063, %v1495_v16  }
 0x617   :  { %v1501_v27 = vsub.f32 %v1497_v55, %v1499_v63 }
 0x618   :  { %v1482_v19 = vpop.xlane.xlu0 %1481 }
 0x619   :  { %v1503_v4 = vmax.f32 %v1501_v27, 0.0  ;;  %v1484_v0 = vadd.f32 %v1482_v19, %v1464_v52 }
 0x61a   :  { %v1492_v10 = vpop.xlane.xlu2 %1491 }
 0x61b   :  { %2072 = vrsqrt.f32 %v1503_v4  ;;  %v1496_v11 = vmul.f32 0.0078125, %v1484_v0  ;;  %v1494_v23 = vadd.f32 %v1492_v10, %v1474_v7  ;;  %vm1513_vm1 = vweird.f32 %v1503_v4 }
 0x61d   :  { %v1500_v13 = vmul.f32 %v1496_v11, %v1496_v11  ;;  %v1498_v15 = vmul.f32 0.0078125, %v1494_v23  ;;  %1534 = vperm.xlu2 %2065, %v1496_v11  }
 0x61f   :  { %v1502_v54 = vsub.f32 %v1498_v15, %v1500_v13 }
 0x621   :  { %v2073_v17 = vpop.eup %2072  ;;  %v1504_v14 = vmax.f32 %v1502_v54, 0.0 }
 0x622   :  { %v1508_v18 = vmul.f32 %v2073_v17, %v1503_v4  ;;  %vm1514_vm15 = vweird.f32 %v2073_v17 }
 0x623   :  { %2074 = vrsqrt.f32 %v1504_v14  ;;  %vm1515_vm2 = vmor %vm1513_vm1, %vm1514_vm15  ;;  %vm1523_vm4 = vweird.f32 %v1504_v14 }
 0x624   :  { %v1509_v60 = vmul.f32 %v2073_v17, %v1508_v18 }
 0x626   :  { %v1510_v20 = vmul.f32 0.5, %v1509_v60 }
 0x628   :  { %v1511_v58 = vsub.f32 1.5, %v1510_v20 }
 0x629   :  { %v2075_v3 = vpop.eup %2074 }
 0x62a   :  { %v1518_v12 = vmul.f32 %v2075_v3, %v1504_v14  ;;  %v1512_v59 = vmul.f32 %v2073_v17, %v1511_v58  ;;  %vm1524_vm3 = vweird.f32 %v2075_v3 }
 0x62b   :  { %vm1525_vm5 = vmor %vm1523_vm4, %vm1524_vm3 }
 0x62c   :  { %v1516_v6 = vsel %vm1515_vm2, %v2073_v17, %v1512_v59  ;;  %v1519_v22 = vmul.f32 %v2075_v3, %v1518_v12 }
 0x62d   :  { %1543 = vperm.xlu1 %2064, %v1516_v6  }
 0x62e   :  { %v1520_v49 = vmul.f32 0.5, %v1519_v22 }
 0x630   :  { %v1521_v35 = vsub.f32 1.5, %v1520_v49 }
 0x632   :  { %v1522_v24 = vmul.f32 %v2075_v3, %v1521_v35 }
 0x634   :  { %v1526_v48 = vsel %vm1525_vm5, %v2075_v3, %v1522_v24 }
 0x635   :  { %1548 = vperm.xlu1 %2064, %v1526_v48  }
 0x677   :  { %v1535_v2 = vpop.permute.xlu2 %1534 }
 0x678   :  { %v1540_v42 = vsub.f32 %v2900_v62, %v1535_v2 }
 0x687   :  { %v1530_v40 = vpop.permute.xlu0 %1529 }
 0x688   :  { %v1537_v50 = vsub.f32 %v2879_v25, %v1530_v40  ;;  %v1539_v51 = vsub.f32 %v2893_v41, %v1530_v40  ;;  %v1665_v25 = vld [vmem:[%s2993_s10 + $0x30] sm:$0xff]  ;;  %v1538_v41 = vsub.f32 %v2886_v33, %v1535_v2 }
 0x689   :  { %1688 = vmatpush.msra.mxu0 %v1665_v25  ;;  %v1661_v33 = vld [vmem:[%s2993_s10 + $0x10] sm:$0xff] }
 0x68b   :  { %1689 = vmatpush.msra.mxu0 %v1664_v9 }
 0x68d   :  { %1690 = vmatpush.msra.mxu0 %v1663_v45 }
 0x68f   :  { %1691 = vmatpush.msra.mxu0 %v1662_v32 }
 0x691   :  { %1692 = vmatpush.msra.mxu0 %v1661_v33 }
 0x693   :  { %1693 = vmatpush.msra.mxu0 %v1660_v1 }
 0x695   :  { %1694 = vmatpush.msra.mxu0 %v1659_v28 }
 0x69f   :  { %v1544_v53 = vpop.permute.xlu1 %1543 }
 0x6a0   :  { %v2909_v44 = vmul.f32 %v1544_v53, %v1537_v50  ;;  %v2911_v26 = vmul.f32 %v1544_v53, %v1539_v51 }
 0x6a2   :  { %v2917_v29 = vmul.f32 0.70710677, %v2909_v44  ;;  %v2920_v30 = vmul.f32 0.70710677, %v2911_v26 }
 0x6a4   :  { %v1563_v39 = vand.u32 2147483647, %v2917_v29  ;;  %v1565_v34 = vand.u32 2147483647, %v2920_v30  ;;  %vm1639_vm6 = vcmp.ge.f32.partialorder %v2917_v29, 0.0  ;;  %vm1641_vm8 = vcmp.ge.f32.partialorder %v2920_v30, 0.0 }
 0x6a6   :  { %v1567_v37 = vmul.f32 0.3275911, %v1563_v39  ;;  %v1569_v38 = vmul.f32 0.3275911, %v1565_v34  ;;  %v1615_v16 = vsub.f32 0.0, %v1563_v39  ;;  %v1617_v15 = vsub.f32 0.0, %v1565_v34 }
 0x6a7   :  { %v1549_v8 = vpop.permute.xlu1 %1548 }
 0x6a8   :  { %v1571_v47 = vadd.f32 1.0, %v1567_v37  ;;  %v1573_v57 = vadd.f32 1.0, %v1569_v38  ;;  %v2938_v31 = vmul.f32 %v1549_v8, %v1538_v41  ;;  %v2940_v43 = vmul.f32 %v1549_v8, %v1540_v42 }
 0x6a9   :  { %v1619_v7 = vmul.f32 %v1615_v16, %v1563_v39  ;;  %v1621_v59 = vmul.f32 %v1617_v15, %v1565_v34 }
 0x6aa   :  { %2076 = vrcp.f32 %v1571_v47  ;;  %v2946_v62 = vmul.f32 0.70710677, %v2938_v31  ;;  %v2949_v46 = vmul.f32 0.70710677, %v2940_v43 }
 0x6ab   :  { %2078 = vrcp.f32 %v1573_v57  ;;  %v1623_v54 = vmul.f32 1.442695, %v1619_v7  ;;  %v1627_v53 = vmul.f32 1.442695, %v1621_v59 }
 0x6ac   :  { %v1564_v52 = vand.u32 2147483647, %v2946_v62  ;;  %v1566_v21 = vand.u32 2147483647, %v2949_v46  ;;  %vm1640_vm7 = vcmp.ge.f32.partialorder %v2946_v62, 0.0  ;;  %vm1642_vm9 = vcmp.ge.f32.partialorder %v2949_v46, 0.0 }
 0x6ae   :  { %v1568_v56 = vmul.f32 0.3275911, %v1564_v52  ;;  %v1570_v61 = vmul.f32 0.3275911, %v1566_v21  ;;  %v1616_v60 = vsub.f32 0.0, %v1564_v52  ;;  %v1618_v36 = vsub.f32 0.0, %v1566_v21 }
 0x6b0   :  { %v2077_v5 = vpop.eup %2076  ;;  %v1572_v27 = vadd.f32 1.0, %v1568_v56  ;;  %v1574_v19 = vadd.f32 1.0, %v1570_v61  ;;  %v1620_v24 = vmul.f32 %v1616_v60, %v1564_v52  ;;  %v1622_v8 = vmul.f32 %v1618_v36, %v1566_v21 }
 0x6b1   :  { %v2079_v63 = vpop.eup %2078  ;;  %v1579_v55 = vmul.f32 1.0614054, %v2077_v5  ;;  %v1555_v61 = vmul.f32 0.5, %v2909_v44 }
 0x6b2   :  { %v1581_v4 = vmul.f32 1.0614054, %v2079_v63  ;;  %2080 = vrcp.f32 %v1572_v27  ;;  %v1625_v9 = vmul.f32 1.442695, %v1620_v24  ;;  %v1629_v28 = vmul.f32 1.442695, %v1622_v8 }
 0x6b3   :  { %v1583_v0 = vadd.f32 -1.4531521, %v1579_v55  ;;  %2082 = vrcp.f32 %v1574_v19 }
 0x6b4   :  { %v1585_v10 = vadd.f32 -1.4531521, %v1581_v4  ;;  %2084 = vpow2.f32 %v1623_v54 }
 0x6b5   :  { %v1587_v11 = vmul.f32 %v2077_v5, %v1583_v0  ;;  %2086 = vpow2.f32 %v1627_v53 }
 0x6b6   :  { %v1589_v23 = vmul.f32 %v2079_v63, %v1585_v10  ;;  %2088 = vpow2.f32 %v1625_v9 }
 0x6b7   :  { %v1591_v13 = vadd.f32 1.4214138, %v1587_v11  ;;  %2090 = vpow2.f32 %v1629_v28 }
 0x6b8   :  { %v1593_v17 = vadd.f32 1.4214138, %v1589_v23  ;;  %v2081_v14 = vpop.eup %2080 }
 0x6b9   :  { %v1595_v18 = vmul.f32 %v2077_v5, %v1591_v13  ;;  %v2083_v20 = vpop.eup %2082  ;;  %v1580_v58 = vmul.f32 1.0614054, %v2081_v14 }
 0x6ba   :  { %v1597_v3 = vmul.f32 %v2079_v63, %v1593_v17  ;;  %v1582_v6 = vmul.f32 1.0614054, %v2083_v20  ;;  %v2085_v38 = vpop.eup %2084  ;;  %v1556_v17 = vmul.f32 0.5, %v2938_v31  ;;  %v1558_v31 = vmul.f32 0.5, %v2940_v43 }
 0x6bb   :  { %v1599_v12 = vadd.f32 -0.28449672, %v1595_v18  ;;  %v1584_v22 = vadd.f32 -1.4531521, %v1580_v58  ;;  %v2087_v16 = vpop.eup %2086 }
 0x6bc   :  { %v1601_v49 = vadd.f32 -0.28449672, %v1597_v3  ;;  %v1586_v48 = vadd.f32 -1.4531521, %v1582_v6  ;;  %v2089_v0 = vpop.eup %2088 }
 0x6bd   :  { %v1603_v35 = vmul.f32 %v2077_v5, %v1599_v12  ;;  %v1588_v40 = vmul.f32 %v2081_v14, %v1584_v22  ;;  %v2091_v29 = vpop.eup %2090 }
 0x6be   :  { %v1605_v50 = vmul.f32 %v2079_v63, %v1601_v49  ;;  %v1590_v25 = vmul.f32 %v2083_v20, %v1586_v48 }
 0x6bf   :  { %v1607_v51 = vadd.f32 0.2548296, %v1603_v35  ;;  %v1592_v2 = vadd.f32 1.4214138, %v1588_v40 }
 0x6c0   :  { %v1594_v37 = vadd.f32 1.4214138, %v1590_v25  ;;  %v1609_v34 = vadd.f32 0.2548296, %v1605_v50 }
 0x6c1   :  { %v1611_v39 = vmul.f32 %v2077_v5, %v1607_v51  ;;  %v1596_v41 = vmul.f32 %v2081_v14, %v1592_v2 }
 0x6c2   :  { %v1598_v45 = vmul.f32 %v2083_v20, %v1594_v37  ;;  %v1613_v1 = vmul.f32 %v2079_v63, %v1609_v34 }
 0x6c3   :  { %v1631_v42 = vmul.f32 %v2085_v38, %v1611_v39  ;;  %v1600_v47 = vadd.f32 -0.28449672, %v1596_v41 }
 0x6c4   :  { %v1602_v32 = vadd.f32 -0.28449672, %v1598_v45  ;;  %v1633_v21 = vmul.f32 %v2087_v16, %v1613_v1 }
 0x6c5   :  { %v1635_v57 = vsub.f32 1.0, %v1631_v42  ;;  %v1604_v33 = vmul.f32 %v2081_v14, %v1600_v47 }
 0x6c6   :  { %v1606_v56 = vmul.f32 %v2083_v20, %v1602_v32  ;;  %v1637_v11 = vsub.f32 1.0, %v1633_v21 }
 0x6c7   :  { %v1643_v52 = vsub.f32 0.0, %v1635_v57  ;;  %v1608_v5 = vadd.f32 0.2548296, %v1604_v33 }
 0x6c8   :  { %v1610_v4 = vadd.f32 0.2548296, %v1606_v56  ;;  %v1645_v44 = vsub.f32 0.0, %v1637_v11 }
 0x6c9   :  { %v1647_v55 = vsel %vm1639_vm6, %v1635_v57, %v1643_v52  ;;  %v1612_v19 = vmul.f32 %v2081_v14, %v1608_v5 }
 0x6ca   :  { %v1651_v27 = vadd.f32 1.0, %v1647_v55  ;;  %v1614_v23 = vmul.f32 %v2083_v20, %v1610_v4  ;;  %v1649_v60 = vsel %vm1641_vm8, %v1637_v11, %v1645_v44  ;;  %v1557_v20 = vmul.f32 0.5, %v2911_v26 }
 0x6cb   :  { %v1632_v10 = vmul.f32 %v2089_v0, %v1612_v19  ;;  %v1653_v3 = vadd.f32 1.0, %v1649_v60 }
 0x6cc   :  { %v1655_v7 = vmul.f32 %v1651_v27, %v1555_v61  ;;  %v1634_v54 = vmul.f32 %v2091_v29, %v1614_v23 }
 0x6cd   :  { %v1636_v63 = vsub.f32 1.0, %v1632_v10  ;;  %v1657_v62 = vmul.f32 %v1653_v3, %v1557_v20 }
 0x6ce   :  { %1937 = vmatmul.msk.f32.vlgmr.msra.gmra.mxu0 %vm185_vm0, %v1655_v7  ;;  %v1638_v58 = vsub.f32 1.0, %v1634_v54 }
 0x6cf   :  { %v1644_v13 = vsub.f32 0.0, %v1636_v63 }
 0x6d0   :  { %v1646_v12 = vsub.f32 0.0, %v1638_v58 }
 0x6d1   :  { %v1648_v15 = vsel %vm1640_vm7, %v1636_v63, %v1644_v13 }
 0x6d2   :  { %v1652_v14 = vadd.f32 1.0, %v1648_v15  ;;  %v1650_v59 = vsel %vm1642_vm9, %v1638_v58, %v1646_v12 }
 0x6d3   :  { %v1654_v6 = vadd.f32 1.0, %v1650_v59 }
 0x6d4   :  { %v1656_v18 = vmul.f32 %v1652_v14, %v1556_v17 }
 0x6d5   :  { %v1658_v22 = vmul.f32 %v1654_v6, %v1558_v31 }
 0x6d6   :  { %1938 = vmatmul.msk.f32.gmra.mxu0 %vm185_vm0, %v1656_v18 }
 0x6de   :  { %1939 = vmatmul.msk.f32.gmra.mxu0 %vm185_vm0, %v1657_v62 }
 0x6e6   :  { %1940 = vmatmul.msk.f32.gmra.mxu0 %vm185_vm0, %v1658_v22 }
 0x74b   :  { %v1696_v30 = vpop.f32.mrf.mxu0 }
 0x74c   :  { %1709 = vst.msk [vmem:[%s2994_s11] sm:$0xff] %vm1708_vm10, %v1696_v30 }
 0x753   :  { %v1699_v49 = vpop.f32.mrf.mxu0 }
 0x754   :  { %1710 = vst.msk [vmem:[%s2994_s11 + $0x8] sm:$0xff] %vm1708_vm10, %v1699_v49 }
 0x75b   :  { %v1702_v26 = vpop.f32.mrf.mxu0 }
 0x75c   :  { %1711 = vst.msk [vmem:[%s2994_s11 + $0x10] sm:$0xff] %vm1708_vm10, %v1702_v26 }
 0x763   :  { %v1705_v43 = vpop.f32.mrf.mxu0 }
 0x764   :  { %1712 = vst.msk [vmem:[%s2994_s11 + $0x18] sm:$0xff] %vm1708_vm10, %v1705_v43 }
 0x765   :  { %1717 = vsyncmov [#allocation3] }
 0x768   :  { %s1718_s29 = vpop.sfrf %1717 }
 0x769   :  { %p1941_p0 = scmp.ne.s32.totalorder %s1718_s29, 0 }
 0x76b   :  { %1722 = shalt.err (%p1941_p0)  }

</bundles_post_ra>
